<compile_context>
chip_gen: v7x
topology: tpu7x:2x2x1
jax: 0.10.0
libtpu: 0.0.40
codegen_flags: <defaults>
</compile_context>

<pallas_src>
import jax
import jax.numpy as jnp
from jax.experimental import pallas as pl
from jax.experimental.pallas import tpu as pltpu

LANES = 128      # TPU vreg lane width
HIDDEN = 50      # hidden units of the MLP


def mlp_kernel(w1_ref, b1_ref, w2_ref, b2_ref, x_ref, o_ref):
    """x_ref / o_ref: (TILE_ROWS, 128) lane-dense sample slabs in VMEM.
    w1/b1/w2: (HIDDEN,) f32 and b2: (1,) f32 scalar tables in SMEM."""
    x = x_ref[...]                                           # (TR, 128)
    acc = jnp.zeros_like(x)
    # Hidden loop: per unit j, VPU broadcast-FMA + EUP sigmoid + VPU FMA.
    for j in range(HIDDEN):
        z = x * w1_ref[j] + b1_ref[j]                        # VPU
        h = pl.reciprocal(1.0 + jnp.exp(-z), approx=True)    # EUP exp + EUP rcp
        acc = acc + h * w2_ref[j]                            # VPU
    o_ref[...] = acc + b2_ref[0]


def net_forward(x, params, *, tile_rows=512):
    """x: (N, 1) float32 -> (N, 1) float32.
    params = (w1, b1, w2, b2) with w1, b1, w2: (HIDDEN,) f32 and b2: (1,) f32."""
    w1, b1, w2, b2 = params
    N = x.shape[0]

    # Tile of `tr` rows x 128 lanes (multiple of 8 sublanes); shrink the tile
    # for small batches so tiny inputs are not padded up to 512*128 samples.
    tr = tile_rows
    while tr > 8 and (tr // 2) * LANES >= N:
        tr //= 2
    block_elems = tr * LANES
    total = pl.cdiv(N, block_elems) * block_elems
    rows = total // LANES

    # Lane-dense slab: each row holds 128 consecutive samples (zero padded).
    x_slab = jnp.pad(x.reshape(-1), (0, total - N)).reshape(rows, LANES)

    grid = (rows // tr,)
    y_slab = pl.pallas_call(
        mlp_kernel,
        out_shape=jax.ShapeDtypeStruct((rows, LANES), jnp.float32),
        grid=grid,
        in_specs=[
            pl.BlockSpec(memory_space=pltpu.MemorySpace.SMEM),  # w1 scalars
            pl.BlockSpec(memory_space=pltpu.MemorySpace.SMEM),  # b1 scalars
            pl.BlockSpec(memory_space=pltpu.MemorySpace.SMEM),  # w2 scalars
            pl.BlockSpec(memory_space=pltpu.MemorySpace.SMEM),  # b2 scalar
            pl.BlockSpec((tr, LANES), lambda i: (i, 0)),        # x slab (VMEM)
        ],
        out_specs=pl.BlockSpec((tr, LANES), lambda i: (i, 0)),
        compiler_params=pltpu.CompilerParams(
            # batch rows are independent -> megacore-shardable on v7x
            dimension_semantics=("parallel",),
        ),
    )(w1, b1, w2, b2, x_slab)

    return y_slab.reshape(total)[:N].reshape(N, 1)


def init_params(key, hidden=HIDDEN):
    # Mimic PyTorch Linear init: U(-1/sqrt(fan_in), 1/sqrt(fan_in)).
    k1, k2, k3, k4 = jax.random.split(key, 4)
    bound1 = 1.0                               # fan_in = 1
    w1 = jax.random.uniform(k1, (hidden,), jnp.float32, -bound1, bound1)
    b1 = jax.random.uniform(k2, (hidden,), jnp.float32, -bound1, bound1)
    bound2 = 1.0 / float(hidden) ** 0.5        # fan_in = hidden
    w2 = jax.random.uniform(k3, (hidden,), jnp.float32, -bound2, bound2)
    b2 = jax.random.uniform(k4, (1,), jnp.float32, -bound2, bound2)
    return w1, b1, w2, b2


if __name__ == "__main__":
    key = jax.random.PRNGKey(0)
    pkey, xkey = jax.random.split(key)

    params = init_params(pkey)
    w1, b1, w2, b2 = params

    N = 8  # small batch of scalar inputs, shape (N, 1) like the PyTorch module
    x = jax.random.normal(xkey, (N, 1), jnp.float32)

    y = net_forward(x, params)
    jax.block_until_ready(y)

    # Pure-JAX reference (exact sigmoid); the kernel uses the EUP's approximate
    # reciprocal, so allow a small absolute tolerance.
    z = x * w1[None, :] + b1[None, :]          # (N, HIDDEN)
    h = 1.0 / (1.0 + jnp.exp(-z))
    ref = h @ w2[:, None] + b2[0]              # (N, 1)

    assert y.shape == (N, 1)
    assert jnp.allclose(y, ref, atol=5e-3, rtol=0.0), float(jnp.max(jnp.abs(y - ref)))

    print("KERNEL_OK")
</pallas_src>

<mosaic_0001>
module attributes {stable_mosaic.version = 11 : i64} {
  func.func @mlp_kernel(%arg0: i32, %arg1: memref<50xf32, #tpu.memory_space<smem>>, %arg2: memref<50xf32, #tpu.memory_space<smem>>, %arg3: memref<50xf32, #tpu.memory_space<smem>>, %arg4: memref<1xf32, #tpu.memory_space<smem>>, %arg5: memref<8x128xf32, #tpu.memory_space<vmem>>, %arg6: memref<8x128xf32, #tpu.memory_space<vmem>>) attributes {dimension_semantics = [#tpu.dimension_semantics<parallel>], iteration_bounds = array<i64: 1>, scalar_prefetch = 0 : i64, scratch_operands = 0 : i64, tpu.core_type = #tpu.core_type<tc>, window_params = [{transform_indices = @transform_0, window_bounds = array<i64: 50>}, {transform_indices = @transform_1, window_bounds = array<i64: 50>}, {transform_indices = @transform_2, window_bounds = array<i64: 50>}, {transform_indices = @transform_3, window_bounds = array<i64: 1>}, {transform_indices = @transform_4, window_bounds = array<i64: 8, 128>}, {transform_indices = @transform_5, window_bounds = array<i64: 8, 128>}]} {
    %c0 = arith.constant 0 : index
    %c0_0 = arith.constant 0 : index
    %0 = vector.load %arg5[%c0, %c0_0] : memref<8x128xf32, #tpu.memory_space<vmem>>, vector<8x128xf32>
    %cst = arith.constant 0.000000e+00 : f32
    %1 = vector.broadcast %cst : f32 to vector<8x128xf32>
    %c0_1 = arith.constant 0 : index
    %2 = memref.load %arg1[%c0_1] : memref<50xf32, #tpu.memory_space<smem>>
    %3 = vector.broadcast %2 : f32 to vector<8x128xf32>
    %4 = arith.mulf %0, %3 : vector<8x128xf32>
    %c0_2 = arith.constant 0 : index
    %5 = memref.load %arg2[%c0_2] : memref<50xf32, #tpu.memory_space<smem>>
    %6 = vector.broadcast %5 : f32 to vector<8x128xf32>
    %7 = arith.addf %4, %6 : vector<8x128xf32>
    %cst_3 = arith.constant 0.000000e+00 : f32
    %8 = vector.broadcast %cst_3 : f32 to vector<8x128xf32>
    %9 = arith.subf %8, %7 : vector<8x128xf32>
    %10 = math.exp %9 : vector<8x128xf32>
    %cst_4 = arith.constant 1.000000e+00 : f32
    %11 = vector.broadcast %cst_4 : f32 to vector<8x128xf32>
    %12 = arith.addf %11, %10 : vector<8x128xf32>
    %13 = tpu.reciprocal %12 {approx = true} : vector<8x128xf32> -> vector<8x128xf32>
    %c0_5 = arith.constant 0 : index
    %14 = memref.load %arg3[%c0_5] : memref<50xf32, #tpu.memory_space<smem>>
    %15 = vector.broadcast %14 : f32 to vector<8x128xf32>
    %16 = arith.mulf %13, %15 : vector<8x128xf32>
    %17 = arith.addf %1, %16 : vector<8x128xf32>
    %c1 = arith.constant 1 : index
    %18 = memref.load %arg1[%c1] : memref<50xf32, #tpu.memory_space<smem>>
    %19 = vector.broadcast %18 : f32 to vector<8x128xf32>
    %20 = arith.mulf %0, %19 : vector<8x128xf32>
    %c1_6 = arith.constant 1 : index
    %21 = memref.load %arg2[%c1_6] : memref<50xf32, #tpu.memory_space<smem>>
    %22 = vector.broadcast %21 : f32 to vector<8x128xf32>
    %23 = arith.addf %20, %22 : vector<8x128xf32>
    %cst_7 = arith.constant 0.000000e+00 : f32
    %24 = vector.broadcast %cst_7 : f32 to vector<8x128xf32>
    %25 = arith.subf %24, %23 : vector<8x128xf32>
    %26 = math.exp %25 : vector<8x128xf32>
    %cst_8 = arith.constant 1.000000e+00 : f32
    %27 = vector.broadcast %cst_8 : f32 to vector<8x128xf32>
    %28 = arith.addf %27, %26 : vector<8x128xf32>
    %29 = tpu.reciprocal %28 {approx = true} : vector<8x128xf32> -> vector<8x128xf32>
    %c1_9 = arith.constant 1 : index
    %30 = memref.load %arg3[%c1_9] : memref<50xf32, #tpu.memory_space<smem>>
    %31 = vector.broadcast %30 : f32 to vector<8x128xf32>
    %32 = arith.mulf %29, %31 : vector<8x128xf32>
    %33 = arith.addf %17, %32 : vector<8x128xf32>
    %c2 = arith.constant 2 : index
    %34 = memref.load %arg1[%c2] : memref<50xf32, #tpu.memory_space<smem>>
    %35 = vector.broadcast %34 : f32 to vector<8x128xf32>
    %36 = arith.mulf %0, %35 : vector<8x128xf32>
    %c2_10 = arith.constant 2 : index
    %37 = memref.load %arg2[%c2_10] : memref<50xf32, #tpu.memory_space<smem>>
    %38 = vector.broadcast %37 : f32 to vector<8x128xf32>
    %39 = arith.addf %36, %38 : vector<8x128xf32>
    %cst_11 = arith.constant 0.000000e+00 : f32
    %40 = vector.broadcast %cst_11 : f32 to vector<8x128xf32>
    %41 = arith.subf %40, %39 : vector<8x128xf32>
    %42 = math.exp %41 : vector<8x128xf32>
    %cst_12 = arith.constant 1.000000e+00 : f32
    %43 = vector.broadcast %cst_12 : f32 to vector<8x128xf32>
    %44 = arith.addf %43, %42 : vector<8x128xf32>
    %45 = tpu.reciprocal %44 {approx = true} : vector<8x128xf32> -> vector<8x128xf32>
    %c2_13 = arith.constant 2 : index
    %46 = memref.load %arg3[%c2_13] : memref<50xf32, #tpu.memory_space<smem>>
    %47 = vector.broadcast %46 : f32 to vector<8x128xf32>
    %48 = arith.mulf %45, %47 : vector<8x128xf32>
    %49 = arith.addf %33, %48 : vector<8x128xf32>
    %c3 = arith.constant 3 : index
    %50 = memref.load %arg1[%c3] : memref<50xf32, #tpu.memory_space<smem>>
    %51 = vector.broadcast %50 : f32 to vector<8x128xf32>
    %52 = arith.mulf %0, %51 : vector<8x128xf32>
    %c3_14 = arith.constant 3 : index
    %53 = memref.load %arg2[%c3_14] : memref<50xf32, #tpu.memory_space<smem>>
    %54 = vector.broadcast %53 : f32 to vector<8x128xf32>
    %55 = arith.addf %52, %54 : vector<8x128xf32>
    %cst_15 = arith.constant 0.000000e+00 : f32
    %56 = vector.broadcast %cst_15 : f32 to vector<8x128xf32>
    %57 = arith.subf %56, %55 : vector<8x128xf32>
    %58 = math.exp %57 : vector<8x128xf32>
    %cst_16 = arith.constant 1.000000e+00 : f32
    %59 = vector.broadcast %cst_16 : f32 to vector<8x128xf32>
    %60 = arith.addf %59, %58 : vector<8x128xf32>
    %61 = tpu.reciprocal %60 {approx = true} : vector<8x128xf32> -> vector<8x128xf32>
    %c3_17 = arith.constant 3 : index
    %62 = memref.load %arg3[%c3_17] : memref<50xf32, #tpu.memory_space<smem>>
    %63 = vector.broadcast %62 : f32 to vector<8x128xf32>
    %64 = arith.mulf %61, %63 : vector<8x128xf32>
    %65 = arith.addf %49, %64 : vector<8x128xf32>
    %c4 = arith.constant 4 : index
    %66 = memref.load %arg1[%c4] : memref<50xf32, #tpu.memory_space<smem>>
    %67 = vector.broadcast %66 : f32 to vector<8x128xf32>
    %68 = arith.mulf %0, %67 : vector<8x128xf32>
    %c4_18 = arith.constant 4 : index
    %69 = memref.load %arg2[%c4_18] : memref<50xf32, #tpu.memory_space<smem>>
    %70 = vector.broadcast %69 : f32 to vector<8x128xf32>
    %71 = arith.addf %68, %70 : vector<8x128xf32>
    %cst_19 = arith.constant 0.000000e+00 : f32
    %72 = vector.broadcast %cst_19 : f32 to vector<8x128xf32>
    %73 = arith.subf %72, %71 : vector<8x128xf32>
    %74 = math.exp %73 : vector<8x128xf32>
    %cst_20 = arith.constant 1.000000e+00 : f32
    %75 = vector.broadcast %cst_20 : f32 to vector<8x128xf32>
    %76 = arith.addf %75, %74 : vector<8x128xf32>
    %77 = tpu.reciprocal %76 {approx = true} : vector<8x128xf32> -> vector<8x128xf32>
    %c4_21 = arith.constant 4 : index
    %78 = memref.load %arg3[%c4_21] : memref<50xf32, #tpu.memory_space<smem>>
    %79 = vector.broadcast %78 : f32 to vector<8x128xf32>
    %80 = arith.mulf %77, %79 : vector<8x128xf32>
    %81 = arith.addf %65, %80 : vector<8x128xf32>
    %c5 = arith.constant 5 : index
    %82 = memref.load %arg1[%c5] : memref<50xf32, #tpu.memory_space<smem>>
    %83 = vector.broadcast %82 : f32 to vector<8x128xf32>
    %84 = arith.mulf %0, %83 : vector<8x128xf32>
    %c5_22 = arith.constant 5 : index
    %85 = memref.load %arg2[%c5_22] : memref<50xf32, #tpu.memory_space<smem>>
    %86 = vector.broadcast %85 : f32 to vector<8x128xf32>
    %87 = arith.addf %84, %86 : vector<8x128xf32>
    %cst_23 = arith.constant 0.000000e+00 : f32
    %88 = vector.broadcast %cst_23 : f32 to vector<8x128xf32>
    %89 = arith.subf %88, %87 : vector<8x128xf32>
    %90 = math.exp %89 : vector<8x128xf32>
    %cst_24 = arith.constant 1.000000e+00 : f32
    %91 = vector.broadcast %cst_24 : f32 to vector<8x128xf32>
    %92 = arith.addf %91, %90 : vector<8x128xf32>
    %93 = tpu.reciprocal %92 {approx = true} : vector<8x128xf32> -> vector<8x128xf32>
    %c5_25 = arith.constant 5 : index
    %94 = memref.load %arg3[%c5_25] : memref<50xf32, #tpu.memory_space<smem>>
    %95 = vector.broadcast %94 : f32 to vector<8x128xf32>
    %96 = arith.mulf %93, %95 : vector<8x128xf32>
    %97 = arith.addf %81, %96 : vector<8x128xf32>
    %c6 = arith.constant 6 : index
    %98 = memref.load %arg1[%c6] : memref<50xf32, #tpu.memory_space<smem>>
    %99 = vector.broadcast %98 : f32 to vector<8x128xf32>
    %100 = arith.mulf %0, %99 : vector<8x128xf32>
    %c6_26 = arith.constant 6 : index
    %101 = memref.load %arg2[%c6_26] : memref<50xf32, #tpu.memory_space<smem>>
    %102 = vector.broadcast %101 : f32 to vector<8x128xf32>
    %103 = arith.addf %100, %102 : vector<8x128xf32>
    %cst_27 = arith.constant 0.000000e+00 : f32
    %104 = vector.broadcast %cst_27 : f32 to vector<8x128xf32>
    %105 = arith.subf %104, %103 : vector<8x128xf32>
    %106 = math.exp %105 : vector<8x128xf32>
    %cst_28 = arith.constant 1.000000e+00 : f32
    %107 = vector.broadcast %cst_28 : f32 to vector<8x128xf32>
    %108 = arith.addf %107, %106 : vector<8x128xf32>
    %109 = tpu.reciprocal %108 {approx = true} : vector<8x128xf32> -> vector<8x128xf32>
    %c6_29 = arith.constant 6 : index
    %110 = memref.load %arg3[%c6_29] : memref<50xf32, #tpu.memory_space<smem>>
    %111 = vector.broadcast %110 : f32 to vector<8x128xf32>
    %112 = arith.mulf %109, %111 : vector<8x128xf32>
    %113 = arith.addf %97, %112 : vector<8x128xf32>
    %c7 = arith.constant 7 : index
    %114 = memref.load %arg1[%c7] : memref<50xf32, #tpu.memory_space<smem>>
    %115 = vector.broadcast %114 : f32 to vector<8x128xf32>
    %116 = arith.mulf %0, %115 : vector<8x128xf32>
    %c7_30 = arith.constant 7 : index
    %117 = memref.load %arg2[%c7_30] : memref<50xf32, #tpu.memory_space<smem>>
    %118 = vector.broadcast %117 : f32 to vector<8x128xf32>
    %119 = arith.addf %116, %118 : vector<8x128xf32>
    %cst_31 = arith.constant 0.000000e+00 : f32
    %120 = vector.broadcast %cst_31 : f32 to vector<8x128xf32>
    %121 = arith.subf %120, %119 : vector<8x128xf32>
    %122 = math.exp %121 : vector<8x128xf32>
    %cst_32 = arith.constant 1.000000e+00 : f32
    %123 = vector.broadcast %cst_32 : f32 to vector<8x128xf32>
    %124 = arith.addf %123, %122 : vector<8x128xf32>
    %125 = tpu.reciprocal %124 {approx = true} : vector<8x128xf32> -> vector<8x128xf32>
    %c7_33 = arith.constant 7 : index
    %126 = memref.load %arg3[%c7_33] : memref<50xf32, #tpu.memory_space<smem>>
    %127 = vector.broadcast %126 : f32 to vector<8x128xf32>
    %128 = arith.mulf %125, %127 : vector<8x128xf32>
    %129 = arith.addf %113, %128 : vector<8x128xf32>
    %c8 = arith.constant 8 : index
    %130 = memref.load %arg1[%c8] : memref<50xf32, #tpu.memory_space<smem>>
    %131 = vector.broadcast %130 : f32 to vector<8x128xf32>
    %132 = arith.mulf %0, %131 : vector<8x128xf32>
    %c8_34 = arith.constant 8 : index
    %133 = memref.load %arg2[%c8_34] : memref<50xf32, #tpu.memory_space<smem>>
    %134 = vector.broadcast %133 : f32 to vector<8x128xf32>
    %135 = arith.addf %132, %134 : vector<8x128xf32>
    %cst_35 = arith.constant 0.000000e+00 : f32
    %136 = vector.broadcast %cst_35 : f32 to vector<8x128xf32>
    %137 = arith.subf %136, %135 : vector<8x128xf32>
    %138 = math.exp %137 : vector<8x128xf32>
    %cst_36 = arith.constant 1.000000e+00 : f32
    %139 = vector.broadcast %cst_36 : f32 to vector<8x128xf32>
    %140 = arith.addf %139, %138 : vector<8x128xf32>
    %141 = tpu.reciprocal %140 {approx = true} : vector<8x128xf32> -> vector<8x128xf32>
    %c8_37 = arith.constant 8 : index
    %142 = memref.load %arg3[%c8_37] : memref<50xf32, #tpu.memory_space<smem>>
    %143 = vector.broadcast %142 : f32 to vector<8x128xf32>
    %144 = arith.mulf %141, %143 : vector<8x128xf32>
    %145 = arith.addf %129, %144 : vector<8x128xf32>
    %c9 = arith.constant 9 : index
    %146 = memref.load %arg1[%c9] : memref<50xf32, #tpu.memory_space<smem>>
    %147 = vector.broadcast %146 : f32 to vector<8x128xf32>
    %148 = arith.mulf %0, %147 : vector<8x128xf32>
    %c9_38 = arith.constant 9 : index
    %149 = memref.load %arg2[%c9_38] : memref<50xf32, #tpu.memory_space<smem>>
    %150 = vector.broadcast %149 : f32 to vector<8x128xf32>
    %151 = arith.addf %148, %150 : vector<8x128xf32>
    %cst_39 = arith.constant 0.000000e+00 : f32
    %152 = vector.broadcast %cst_39 : f32 to vector<8x128xf32>
    %153 = arith.subf %152, %151 : vector<8x128xf32>
    %154 = math.exp %153 : vector<8x128xf32>
    %cst_40 = arith.constant 1.000000e+00 : f32
    %155 = vector.broadcast %cst_40 : f32 to vector<8x128xf32>
    %156 = arith.addf %155, %154 : vector<8x128xf32>
    %157 = tpu.reciprocal %156 {approx = true} : vector<8x128xf32> -> vector<8x128xf32>
    %c9_41 = arith.constant 9 : index
    %158 = memref.load %arg3[%c9_41] : memref<50xf32, #tpu.memory_space<smem>>
    %159 = vector.broadcast %158 : f32 to vector<8x128xf32>
    %160 = arith.mulf %157, %159 : vector<8x128xf32>
    %161 = arith.addf %145, %160 : vector<8x128xf32>
    %c10 = arith.constant 10 : index
    %162 = memref.load %arg1[%c10] : memref<50xf32, #tpu.memory_space<smem>>
    %163 = vector.broadcast %162 : f32 to vector<8x128xf32>
    %164 = arith.mulf %0, %163 : vector<8x128xf32>
    %c10_42 = arith.constant 10 : index
    %165 = memref.load %arg2[%c10_42] : memref<50xf32, #tpu.memory_space<smem>>
    %166 = vector.broadcast %165 : f32 to vector<8x128xf32>
    %167 = arith.addf %164, %166 : vector<8x128xf32>
    %cst_43 = arith.constant 0.000000e+00 : f32
    %168 = vector.broadcast %cst_43 : f32 to vector<8x128xf32>
    %169 = arith.subf %168, %167 : vector<8x128xf32>
    %170 = math.exp %169 : vector<8x128xf32>
    %cst_44 = arith.constant 1.000000e+00 : f32
    %171 = vector.broadcast %cst_44 : f32 to vector<8x128xf32>
    %172 = arith.addf %171, %170 : vector<8x128xf32>
    %173 = tpu.reciprocal %172 {approx = true} : vector<8x128xf32> -> vector<8x128xf32>
    %c10_45 = arith.constant 10 : index
    %174 = memref.load %arg3[%c10_45] : memref<50xf32, #tpu.memory_space<smem>>
    %175 = vector.broadcast %174 : f32 to vector<8x128xf32>
    %176 = arith.mulf %173, %175 : vector<8x128xf32>
    %177 = arith.addf %161, %176 : vector<8x128xf32>
    %c11 = arith.constant 11 : index
    %178 = memref.load %arg1[%c11] : memref<50xf32, #tpu.memory_space<smem>>
    %179 = vector.broadcast %178 : f32 to vector<8x128xf32>
    %180 = arith.mulf %0, %179 : vector<8x128xf32>
    %c11_46 = arith.constant 11 : index
    %181 = memref.load %arg2[%c11_46] : memref<50xf32, #tpu.memory_space<smem>>
    %182 = vector.broadcast %181 : f32 to vector<8x128xf32>
    %183 = arith.addf %180, %182 : vector<8x128xf32>
    %cst_47 = arith.constant 0.000000e+00 : f32
    %184 = vector.broadcast %cst_47 : f32 to vector<8x128xf32>
    %185 = arith.subf %184, %183 : vector<8x128xf32>
    %186 = math.exp %185 : vector<8x128xf32>
    %cst_48 = arith.constant 1.000000e+00 : f32
    %187 = vector.broadcast %cst_48 : f32 to vector<8x128xf32>
    %188 = arith.addf %187, %186 : vector<8x128xf32>
    %189 = tpu.reciprocal %188 {approx = true} : vector<8x128xf32> -> vector<8x128xf32>
    %c11_49 = arith.constant 11 : index
    %190 = memref.load %arg3[%c11_49] : memref<50xf32, #tpu.memory_space<smem>>
    %191 = vector.broadcast %190 : f32 to vector<8x128xf32>
    %192 = arith.mulf %189, %191 : vector<8x128xf32>
    %193 = arith.addf %177, %192 : vector<8x128xf32>
    %c12 = arith.constant 12 : index
    %194 = memref.load %arg1[%c12] : memref<50xf32, #tpu.memory_space<smem>>
    %195 = vector.broadcast %194 : f32 to vector<8x128xf32>
    %196 = arith.mulf %0, %195 : vector<8x128xf32>
    %c12_50 = arith.constant 12 : index
    %197 = memref.load %arg2[%c12_50] : memref<50xf32, #tpu.memory_space<smem>>
    %198 = vector.broadcast %197 : f32 to vector<8x128xf32>
    %199 = arith.addf %196, %198 : vector<8x128xf32>
    %cst_51 = arith.constant 0.000000e+00 : f32
    %200 = vector.broadcast %cst_51 : f32 to vector<8x128xf32>
    %201 = arith.subf %200, %199 : vector<8x128xf32>
    %202 = math.exp %201 : vector<8x128xf32>
    %cst_52 = arith.constant 1.000000e+00 : f32
    %203 = vector.broadcast %cst_52 : f32 to vector<8x128xf32>
    %204 = arith.addf %203, %202 : vector<8x128xf32>
    %205 = tpu.reciprocal %204 {approx = true} : vector<8x128xf32> -> vector<8x128xf32>
    %c12_53 = arith.constant 12 : index
    %206 = memref.load %arg3[%c12_53] : memref<50xf32, #tpu.memory_space<smem>>
    %207 = vector.broadcast %206 : f32 to vector<8x128xf32>
    %208 = arith.mulf %205, %207 : vector<8x128xf32>
    %209 = arith.addf %193, %208 : vector<8x128xf32>
    %c13 = arith.constant 13 : index
    %210 = memref.load %arg1[%c13] : memref<50xf32, #tpu.memory_space<smem>>
    %211 = vector.broadcast %210 : f32 to vector<8x128xf32>
    %212 = arith.mulf %0, %211 : vector<8x128xf32>
    %c13_54 = arith.constant 13 : index
    %213 = memref.load %arg2[%c13_54] : memref<50xf32, #tpu.memory_space<smem>>
    %214 = vector.broadcast %213 : f32 to vector<8x128xf32>
    %215 = arith.addf %212, %214 : vector<8x128xf32>
    %cst_55 = arith.constant 0.000000e+00 : f32
    %216 = vector.broadcast %cst_55 : f32 to vector<8x128xf32>
    %217 = arith.subf %216, %215 : vector<8x128xf32>
    %218 = math.exp %217 : vector<8x128xf32>
    %cst_56 = arith.constant 1.000000e+00 : f32
    %219 = vector.broadcast %cst_56 : f32 to vector<8x128xf32>
    %220 = arith.addf %219, %218 : vector<8x128xf32>
    %221 = tpu.reciprocal %220 {approx = true} : vector<8x128xf32> -> vector<8x128xf32>
    %c13_57 = arith.constant 13 : index
    %222 = memref.load %arg3[%c13_57] : memref<50xf32, #tpu.memory_space<smem>>
    %223 = vector.broadcast %222 : f32 to vector<8x128xf32>
    %224 = arith.mulf %221, %223 : vector<8x128xf32>
    %225 = arith.addf %209, %224 : vector<8x128xf32>
    %c14 = arith.constant 14 : index
    %226 = memref.load %arg1[%c14] : memref<50xf32, #tpu.memory_space<smem>>
    %227 = vector.broadcast %226 : f32 to vector<8x128xf32>
    %228 = arith.mulf %0, %227 : vector<8x128xf32>
    %c14_58 = arith.constant 14 : index
    %229 = memref.load %arg2[%c14_58] : memref<50xf32, #tpu.memory_space<smem>>
    %230 = vector.broadcast %229 : f32 to vector<8x128xf32>
    %231 = arith.addf %228, %230 : vector<8x128xf32>
    %cst_59 = arith.constant 0.000000e+00 : f32
    %232 = vector.broadcast %cst_59 : f32 to vector<8x128xf32>
    %233 = arith.subf %232, %231 : vector<8x128xf32>
    %234 = math.exp %233 : vector<8x128xf32>
    %cst_60 = arith.constant 1.000000e+00 : f32
    %235 = vector.broadcast %cst_60 : f32 to vector<8x128xf32>
    %236 = arith.addf %235, %234 : vector<8x128xf32>
    %237 = tpu.reciprocal %236 {approx = true} : vector<8x128xf32> -> vector<8x128xf32>
    %c14_61 = arith.constant 14 : index
    %238 = memref.load %arg3[%c14_61] : memref<50xf32, #tpu.memory_space<smem>>
    %239 = vector.broadcast %238 : f32 to vector<8x128xf32>
    %240 = arith.mulf %237, %239 : vector<8x128xf32>
    %241 = arith.addf %225, %240 : vector<8x128xf32>
    %c15 = arith.constant 15 : index
    %242 = memref.load %arg1[%c15] : memref<50xf32, #tpu.memory_space<smem>>
    %243 = vector.broadcast %242 : f32 to vector<8x128xf32>
    %244 = arith.mulf %0, %243 : vector<8x128xf32>
    %c15_62 = arith.constant 15 : index
    %245 = memref.load %arg2[%c15_62] : memref<50xf32, #tpu.memory_space<smem>>
    %246 = vector.broadcast %245 : f32 to vector<8x128xf32>
    %247 = arith.addf %244, %246 : vector<8x128xf32>
    %cst_63 = arith.constant 0.000000e+00 : f32
    %248 = vector.broadcast %cst_63 : f32 to vector<8x128xf32>
    %249 = arith.subf %248, %247 : vector<8x128xf32>
    %250 = math.exp %249 : vector<8x128xf32>
    %cst_64 = arith.constant 1.000000e+00 : f32
    %251 = vector.broadcast %cst_64 : f32 to vector<8x128xf32>
    %252 = arith.addf %251, %250 : vector<8x128xf32>
    %253 = tpu.reciprocal %252 {approx = true} : vector<8x128xf32> -> vector<8x128xf32>
    %c15_65 = arith.constant 15 : index
    %254 = memref.load %arg3[%c15_65] : memref<50xf32, #tpu.memory_space<smem>>
    %255 = vector.broadcast %254 : f32 to vector<8x128xf32>
    %256 = arith.mulf %253, %255 : vector<8x128xf32>
    %257 = arith.addf %241, %256 : vector<8x128xf32>
    %c16 = arith.constant 16 : index
    %258 = memref.load %arg1[%c16] : memref<50xf32, #tpu.memory_space<smem>>
    %259 = vector.broadcast %258 : f32 to vector<8x128xf32>
    %260 = arith.mulf %0, %259 : vector<8x128xf32>
    %c16_66 = arith.constant 16 : index
    %261 = memref.load %arg2[%c16_66] : memref<50xf32, #tpu.memory_space<smem>>
    %262 = vector.broadcast %261 : f32 to vector<8x128xf32>
    %263 = arith.addf %260, %262 : vector<8x128xf32>
    %cst_67 = arith.constant 0.000000e+00 : f32
    %264 = vector.broadcast %cst_67 : f32 to vector<8x128xf32>
    %265 = arith.subf %264, %263 : vector<8x128xf32>
    %266 = math.exp %265 : vector<8x128xf32>
    %cst_68 = arith.constant 1.000000e+00 : f32
    %267 = vector.broadcast %cst_68 : f32 to vector<8x128xf32>
    %268 = arith.addf %267, %266 : vector<8x128xf32>
    %269 = tpu.reciprocal %268 {approx = true} : vector<8x128xf32> -> vector<8x128xf32>
    %c16_69 = arith.constant 16 : index
    %270 = memref.load %arg3[%c16_69] : memref<50xf32, #tpu.memory_space<smem>>
    %271 = vector.broadcast %270 : f32 to vector<8x128xf32>
    %272 = arith.mulf %269, %271 : vector<8x128xf32>
    %273 = arith.addf %257, %272 : vector<8x128xf32>
    %c17 = arith.constant 17 : index
    %274 = memref.load %arg1[%c17] : memref<50xf32, #tpu.memory_space<smem>>
    %275 = vector.broadcast %274 : f32 to vector<8x128xf32>
    %276 = arith.mulf %0, %275 : vector<8x128xf32>
    %c17_70 = arith.constant 17 : index
    %277 = memref.load %arg2[%c17_70] : memref<50xf32, #tpu.memory_space<smem>>
    %278 = vector.broadcast %277 : f32 to vector<8x128xf32>
    %279 = arith.addf %276, %278 : vector<8x128xf32>
    %cst_71 = arith.constant 0.000000e+00 : f32
    %280 = vector.broadcast %cst_71 : f32 to vector<8x128xf32>
    %281 = arith.subf %280, %279 : vector<8x128xf32>
    %282 = math.exp %281 : vector<8x128xf32>
    %cst_72 = arith.constant 1.000000e+00 : f32
    %283 = vector.broadcast %cst_72 : f32 to vector<8x128xf32>
    %284 = arith.addf %283, %282 : vector<8x128xf32>
    %285 = tpu.reciprocal %284 {approx = true} : vector<8x128xf32> -> vector<8x128xf32>
    %c17_73 = arith.constant 17 : index
    %286 = memref.load %arg3[%c17_73] : memref<50xf32, #tpu.memory_space<smem>>
    %287 = vector.broadcast %286 : f32 to vector<8x128xf32>
    %288 = arith.mulf %285, %287 : vector<8x128xf32>
    %289 = arith.addf %273, %288 : vector<8x128xf32>
    %c18 = arith.constant 18 : index
    %290 = memref.load %arg1[%c18] : memref<50xf32, #tpu.memory_space<smem>>
    %291 = vector.broadcast %290 : f32 to vector<8x128xf32>
    %292 = arith.mulf %0, %291 : vector<8x128xf32>
    %c18_74 = arith.constant 18 : index
    %293 = memref.load %arg2[%c18_74] : memref<50xf32, #tpu.memory_space<smem>>
    %294 = vector.broadcast %293 : f32 to vector<8x128xf32>
    %295 = arith.addf %292, %294 : vector<8x128xf32>
    %cst_75 = arith.constant 0.000000e+00 : f32
    %296 = vector.broadcast %cst_75 : f32 to vector<8x128xf32>
    %297 = arith.subf %296, %295 : vector<8x128xf32>
    %298 = math.exp %297 : vector<8x128xf32>
    %cst_76 = arith.constant 1.000000e+00 : f32
    %299 = vector.broadcast %cst_76 : f32 to vector<8x128xf32>
    %300 = arith.addf %299, %298 : vector<8x128xf32>
    %301 = tpu.reciprocal %300 {approx = true} : vector<8x128xf32> -> vector<8x128xf32>
    %c18_77 = arith.constant 18 : index
    %302 = memref.load %arg3[%c18_77] : memref<50xf32, #tpu.memory_space<smem>>
    %303 = vector.broadcast %302 : f32 to vector<8x128xf32>
    %304 = arith.mulf %301, %303 : vector<8x128xf32>
    %305 = arith.addf %289, %304 : vector<8x128xf32>
    %c19 = arith.constant 19 : index
    %306 = memref.load %arg1[%c19] : memref<50xf32, #tpu.memory_space<smem>>
    %307 = vector.broadcast %306 : f32 to vector<8x128xf32>
    %308 = arith.mulf %0, %307 : vector<8x128xf32>
    %c19_78 = arith.constant 19 : index
    %309 = memref.load %arg2[%c19_78] : memref<50xf32, #tpu.memory_space<smem>>
    %310 = vector.broadcast %309 : f32 to vector<8x128xf32>
    %311 = arith.addf %308, %310 : vector<8x128xf32>
    %cst_79 = arith.constant 0.000000e+00 : f32
    %312 = vector.broadcast %cst_79 : f32 to vector<8x128xf32>
    %313 = arith.subf %312, %311 : vector<8x128xf32>
    %314 = math.exp %313 : vector<8x128xf32>
    %cst_80 = arith.constant 1.000000e+00 : f32
    %315 = vector.broadcast %cst_80 : f32 to vector<8x128xf32>
    %316 = arith.addf %315, %314 : vector<8x128xf32>
    %317 = tpu.reciprocal %316 {approx = true} : vector<8x128xf32> -> vector<8x128xf32>
    %c19_81 = arith.constant 19 : index
    %318 = memref.load %arg3[%c19_81] : memref<50xf32, #tpu.memory_space<smem>>
    %319 = vector.broadcast %318 : f32 to vector<8x128xf32>
    %320 = arith.mulf %317, %319 : vector<8x128xf32>
    %321 = arith.addf %305, %320 : vector<8x128xf32>
    %c20 = arith.constant 20 : index
    %322 = memref.load %arg1[%c20] : memref<50xf32, #tpu.memory_space<smem>>
    %323 = vector.broadcast %322 : f32 to vector<8x128xf32>
    %324 = arith.mulf %0, %323 : vector<8x128xf32>
    %c20_82 = arith.constant 20 : index
    %325 = memref.load %arg2[%c20_82] : memref<50xf32, #tpu.memory_space<smem>>
    %326 = vector.broadcast %325 : f32 to vector<8x128xf32>
    %327 = arith.addf %324, %326 : vector<8x128xf32>
    %cst_83 = arith.constant 0.000000e+00 : f32
    %328 = vector.broadcast %cst_83 : f32 to vector<8x128xf32>
    %329 = arith.subf %328, %327 : vector<8x128xf32>
    %330 = math.exp %329 : vector<8x128xf32>
    %cst_84 = arith.constant 1.000000e+00 : f32
    %331 = vector.broadcast %cst_84 : f32 to vector<8x128xf32>
    %332 = arith.addf %331, %330 : vector<8x128xf32>
    %333 = tpu.reciprocal %332 {approx = true} : vector<8x128xf32> -> vector<8x128xf32>
    %c20_85 = arith.constant 20 : index
    %334 = memref.load %arg3[%c20_85] : memref<50xf32, #tpu.memory_space<smem>>
    %335 = vector.broadcast %334 : f32 to vector<8x128xf32>
    %336 = arith.mulf %333, %335 : vector<8x128xf32>
    %337 = arith.addf %321, %336 : vector<8x128xf32>
    %c21 = arith.constant 21 : index
    %338 = memref.load %arg1[%c21] : memref<50xf32, #tpu.memory_space<smem>>
    %339 = vector.broadcast %338 : f32 to vector<8x128xf32>
    %340 = arith.mulf %0, %339 : vector<8x128xf32>
    %c21_86 = arith.constant 21 : index
    %341 = memref.load %arg2[%c21_86] : memref<50xf32, #tpu.memory_space<smem>>
    %342 = vector.broadcast %341 : f32 to vector<8x128xf32>
    %343 = arith.addf %340, %342 : vector<8x128xf32>
    %cst_87 = arith.constant 0.000000e+00 : f32
    %344 = vector.broadcast %cst_87 : f32 to vector<8x128xf32>
    %345 = arith.subf %344, %343 : vector<8x128xf32>
    %346 = math.exp %345 : vector<8x128xf32>
    %cst_88 = arith.constant 1.000000e+00 : f32
    %347 = vector.broadcast %cst_88 : f32 to vector<8x128xf32>
    %348 = arith.addf %347, %346 : vector<8x128xf32>
    %349 = tpu.reciprocal %348 {approx = true} : vector<8x128xf32> -> vector<8x128xf32>
    %c21_89 = arith.constant 21 : index
    %350 = memref.load %arg3[%c21_89] : memref<50xf32, #tpu.memory_space<smem>>
    %351 = vector.broadcast %350 : f32 to vector<8x128xf32>
    %352 = arith.mulf %349, %351 : vector<8x128xf32>
    %353 = arith.addf %337, %352 : vector<8x128xf32>
    %c22 = arith.constant 22 : index
    %354 = memref.load %arg1[%c22] : memref<50xf32, #tpu.memory_space<smem>>
    %355 = vector.broadcast %354 : f32 to vector<8x128xf32>
    %356 = arith.mulf %0, %355 : vector<8x128xf32>
    %c22_90 = arith.constant 22 : index
    %357 = memref.load %arg2[%c22_90] : memref<50xf32, #tpu.memory_space<smem>>
    %358 = vector.broadcast %357 : f32 to vector<8x128xf32>
    %359 = arith.addf %356, %358 : vector<8x128xf32>
    %cst_91 = arith.constant 0.000000e+00 : f32
    %360 = vector.broadcast %cst_91 : f32 to vector<8x128xf32>
    %361 = arith.subf %360, %359 : vector<8x128xf32>
    %362 = math.exp %361 : vector<8x128xf32>
    %cst_92 = arith.constant 1.000000e+00 : f32
    %363 = vector.broadcast %cst_92 : f32 to vector<8x128xf32>
    %364 = arith.addf %363, %362 : vector<8x128xf32>
    %365 = tpu.reciprocal %364 {approx = true} : vector<8x128xf32> -> vector<8x128xf32>
    %c22_93 = arith.constant 22 : index
    %366 = memref.load %arg3[%c22_93] : memref<50xf32, #tpu.memory_space<smem>>
    %367 = vector.broadcast %366 : f32 to vector<8x128xf32>
    %368 = arith.mulf %365, %367 : vector<8x128xf32>
    %369 = arith.addf %353, %368 : vector<8x128xf32>
    %c23 = arith.constant 23 : index
    %370 = memref.load %arg1[%c23] : memref<50xf32, #tpu.memory_space<smem>>
    %371 = vector.broadcast %370 : f32 to vector<8x128xf32>
    %372 = arith.mulf %0, %371 : vector<8x128xf32>
    %c23_94 = arith.constant 23 : index
    %373 = memref.load %arg2[%c23_94] : memref<50xf32, #tpu.memory_space<smem>>
    %374 = vector.broadcast %373 : f32 to vector<8x128xf32>
    %375 = arith.addf %372, %374 : vector<8x128xf32>
    %cst_95 = arith.constant 0.000000e+00 : f32
    %376 = vector.broadcast %cst_95 : f32 to vector<8x128xf32>
    %377 = arith.subf %376, %375 : vector<8x128xf32>
    %378 = math.exp %377 : vector<8x128xf32>
    %cst_96 = arith.constant 1.000000e+00 : f32
    %379 = vector.broadcast %cst_96 : f32 to vector<8x128xf32>
    %380 = arith.addf %379, %378 : vector<8x128xf32>
    %381 = tpu.reciprocal %380 {approx = true} : vector<8x128xf32> -> vector<8x128xf32>
    %c23_97 = arith.constant 23 : index
    %382 = memref.load %arg3[%c23_97] : memref<50xf32, #tpu.memory_space<smem>>
    %383 = vector.broadcast %382 : f32 to vector<8x128xf32>
    %384 = arith.mulf %381, %383 : vector<8x128xf32>
    %385 = arith.addf %369, %384 : vector<8x128xf32>
    %c24 = arith.constant 24 : index
    %386 = memref.load %arg1[%c24] : memref<50xf32, #tpu.memory_space<smem>>
    %387 = vector.broadcast %386 : f32 to vector<8x128xf32>
    %388 = arith.mulf %0, %387 : vector<8x128xf32>
    %c24_98 = arith.constant 24 : index
    %389 = memref.load %arg2[%c24_98] : memref<50xf32, #tpu.memory_space<smem>>
    %390 = vector.broadcast %389 : f32 to vector<8x128xf32>
    %391 = arith.addf %388, %390 : vector<8x128xf32>
    %cst_99 = arith.constant 0.000000e+00 : f32
    %392 = vector.broadcast %cst_99 : f32 to vector<8x128xf32>
    %393 = arith.subf %392, %391 : vector<8x128xf32>
    %394 = math.exp %393 : vector<8x128xf32>
    %cst_100 = arith.constant 1.000000e+00 : f32
    %395 = vector.broadcast %cst_100 : f32 to vector<8x128xf32>
    %396 = arith.addf %395, %394 : vector<8x128xf32>
    %397 = tpu.reciprocal %396 {approx = true} : vector<8x128xf32> -> vector<8x128xf32>
    %c24_101 = arith.constant 24 : index
    %398 = memref.load %arg3[%c24_101] : memref<50xf32, #tpu.memory_space<smem>>
    %399 = vector.broadcast %398 : f32 to vector<8x128xf32>
    %400 = arith.mulf %397, %399 : vector<8x128xf32>
    %401 = arith.addf %385, %400 : vector<8x128xf32>
    %c25 = arith.constant 25 : index
    %402 = memref.load %arg1[%c25] : memref<50xf32, #tpu.memory_space<smem>>
    %403 = vector.broadcast %402 : f32 to vector<8x128xf32>
    %404 = arith.mulf %0, %403 : vector<8x128xf32>
    %c25_102 = arith.constant 25 : index
    %405 = memref.load %arg2[%c25_102] : memref<50xf32, #tpu.memory_space<smem>>
    %406 = vector.broadcast %405 : f32 to vector<8x128xf32>
    %407 = arith.addf %404, %406 : vector<8x128xf32>
    %cst_103 = arith.constant 0.000000e+00 : f32
    %408 = vector.broadcast %cst_103 : f32 to vector<8x128xf32>
    %409 = arith.subf %408, %407 : vector<8x128xf32>
    %410 = math.exp %409 : vector<8x128xf32>
    %cst_104 = arith.constant 1.000000e+00 : f32
    %411 = vector.broadcast %cst_104 : f32 to vector<8x128xf32>
    %412 = arith.addf %411, %410 : vector<8x128xf32>
    %413 = tpu.reciprocal %412 {approx = true} : vector<8x128xf32> -> vector<8x128xf32>
    %c25_105 = arith.constant 25 : index
    %414 = memref.load %arg3[%c25_105] : memref<50xf32, #tpu.memory_space<smem>>
    %415 = vector.broadcast %414 : f32 to vector<8x128xf32>
    %416 = arith.mulf %413, %415 : vector<8x128xf32>
    %417 = arith.addf %401, %416 : vector<8x128xf32>
    %c26 = arith.constant 26 : index
    %418 = memref.load %arg1[%c26] : memref<50xf32, #tpu.memory_space<smem>>
    %419 = vector.broadcast %418 : f32 to vector<8x128xf32>
    %420 = arith.mulf %0, %419 : vector<8x128xf32>
    %c26_106 = arith.constant 26 : index
    %421 = memref.load %arg2[%c26_106] : memref<50xf32, #tpu.memory_space<smem>>
    %422 = vector.broadcast %421 : f32 to vector<8x128xf32>
    %423 = arith.addf %420, %422 : vector<8x128xf32>
    %cst_107 = arith.constant 0.000000e+00 : f32
    %424 = vector.broadcast %cst_107 : f32 to vector<8x128xf32>
    %425 = arith.subf %424, %423 : vector<8x128xf32>
    %426 = math.exp %425 : vector<8x128xf32>
    %cst_108 = arith.constant 1.000000e+00 : f32
    %427 = vector.broadcast %cst_108 : f32 to vector<8x128xf32>
    %428 = arith.addf %427, %426 : vector<8x128xf32>
    %429 = tpu.reciprocal %428 {approx = true} : vector<8x128xf32> -> vector<8x128xf32>
    %c26_109 = arith.constant 26 : index
    %430 = memref.load %arg3[%c26_109] : memref<50xf32, #tpu.memory_space<smem>>
    %431 = vector.broadcast %430 : f32 to vector<8x128xf32>
    %432 = arith.mulf %429, %431 : vector<8x128xf32>
    %433 = arith.addf %417, %432 : vector<8x128xf32>
    %c27 = arith.constant 27 : index
    %434 = memref.load %arg1[%c27] : memref<50xf32, #tpu.memory_space<smem>>
    %435 = vector.broadcast %434 : f32 to vector<8x128xf32>
    %436 = arith.mulf %0, %435 : vector<8x128xf32>
    %c27_110 = arith.constant 27 : index
    %437 = memref.load %arg2[%c27_110] : memref<50xf32, #tpu.memory_space<smem>>
    %438 = vector.broadcast %437 : f32 to vector<8x128xf32>
    %439 = arith.addf %436, %438 : vector<8x128xf32>
    %cst_111 = arith.constant 0.000000e+00 : f32
    %440 = vector.broadcast %cst_111 : f32 to vector<8x128xf32>
    %441 = arith.subf %440, %439 : vector<8x128xf32>
    %442 = math.exp %441 : vector<8x128xf32>
    %cst_112 = arith.constant 1.000000e+00 : f32
    %443 = vector.broadcast %cst_112 : f32 to vector<8x128xf32>
    %444 = arith.addf %443, %442 : vector<8x128xf32>
    %445 = tpu.reciprocal %444 {approx = true} : vector<8x128xf32> -> vector<8x128xf32>
    %c27_113 = arith.constant 27 : index
    %446 = memref.load %arg3[%c27_113] : memref<50xf32, #tpu.memory_space<smem>>
    %447 = vector.broadcast %446 : f32 to vector<8x128xf32>
    %448 = arith.mulf %445, %447 : vector<8x128xf32>
    %449 = arith.addf %433, %448 : vector<8x128xf32>
    %c28 = arith.constant 28 : index
    %450 = memref.load %arg1[%c28] : memref<50xf32, #tpu.memory_space<smem>>
    %451 = vector.broadcast %450 : f32 to vector<8x128xf32>
    %452 = arith.mulf %0, %451 : vector<8x128xf32>
    %c28_114 = arith.constant 28 : index
    %453 = memref.load %arg2[%c28_114] : memref<50xf32, #tpu.memory_space<smem>>
    %454 = vector.broadcast %453 : f32 to vector<8x128xf32>
    %455 = arith.addf %452, %454 : vector<8x128xf32>
    %cst_115 = arith.constant 0.000000e+00 : f32
    %456 = vector.broadcast %cst_115 : f32 to vector<8x128xf32>
    %457 = arith.subf %456, %455 : vector<8x128xf32>
    %458 = math.exp %457 : vector<8x128xf32>
    %cst_116 = arith.constant 1.000000e+00 : f32
    %459 = vector.broadcast %cst_116 : f32 to vector<8x128xf32>
    %460 = arith.addf %459, %458 : vector<8x128xf32>
    %461 = tpu.reciprocal %460 {approx = true} : vector<8x128xf32> -> vector<8x128xf32>
    %c28_117 = arith.constant 28 : index
    %462 = memref.load %arg3[%c28_117] : memref<50xf32, #tpu.memory_space<smem>>
    %463 = vector.broadcast %462 : f32 to vector<8x128xf32>
    %464 = arith.mulf %461, %463 : vector<8x128xf32>
    %465 = arith.addf %449, %464 : vector<8x128xf32>
    %c29 = arith.constant 29 : index
    %466 = memref.load %arg1[%c29] : memref<50xf32, #tpu.memory_space<smem>>
    %467 = vector.broadcast %466 : f32 to vector<8x128xf32>
    %468 = arith.mulf %0, %467 : vector<8x128xf32>
    %c29_118 = arith.constant 29 : index
    %469 = memref.load %arg2[%c29_118] : memref<50xf32, #tpu.memory_space<smem>>
    %470 = vector.broadcast %469 : f32 to vector<8x128xf32>
    %471 = arith.addf %468, %470 : vector<8x128xf32>
    %cst_119 = arith.constant 0.000000e+00 : f32
    %472 = vector.broadcast %cst_119 : f32 to vector<8x128xf32>
    %473 = arith.subf %472, %471 : vector<8x128xf32>
    %474 = math.exp %473 : vector<8x128xf32>
    %cst_120 = arith.constant 1.000000e+00 : f32
    %475 = vector.broadcast %cst_120 : f32 to vector<8x128xf32>
    %476 = arith.addf %475, %474 : vector<8x128xf32>
    %477 = tpu.reciprocal %476 {approx = true} : vector<8x128xf32> -> vector<8x128xf32>
    %c29_121 = arith.constant 29 : index
    %478 = memref.load %arg3[%c29_121] : memref<50xf32, #tpu.memory_space<smem>>
    %479 = vector.broadcast %478 : f32 to vector<8x128xf32>
    %480 = arith.mulf %477, %479 : vector<8x128xf32>
    %481 = arith.addf %465, %480 : vector<8x128xf32>
    %c30 = arith.constant 30 : index
    %482 = memref.load %arg1[%c30] : memref<50xf32, #tpu.memory_space<smem>>
    %483 = vector.broadcast %482 : f32 to vector<8x128xf32>
    %484 = arith.mulf %0, %483 : vector<8x128xf32>
    %c30_122 = arith.constant 30 : index
    %485 = memref.load %arg2[%c30_122] : memref<50xf32, #tpu.memory_space<smem>>
    %486 = vector.broadcast %485 : f32 to vector<8x128xf32>
    %487 = arith.addf %484, %486 : vector<8x128xf32>
    %cst_123 = arith.constant 0.000000e+00 : f32
    %488 = vector.broadcast %cst_123 : f32 to vector<8x128xf32>
    %489 = arith.subf %488, %487 : vector<8x128xf32>
    %490 = math.exp %489 : vector<8x128xf32>
    %cst_124 = arith.constant 1.000000e+00 : f32
    %491 = vector.broadcast %cst_124 : f32 to vector<8x128xf32>
    %492 = arith.addf %491, %490 : vector<8x128xf32>
    %493 = tpu.reciprocal %492 {approx = true} : vector<8x128xf32> -> vector<8x128xf32>
    %c30_125 = arith.constant 30 : index
    %494 = memref.load %arg3[%c30_125] : memref<50xf32, #tpu.memory_space<smem>>
    %495 = vector.broadcast %494 : f32 to vector<8x128xf32>
    %496 = arith.mulf %493, %495 : vector<8x128xf32>
    %497 = arith.addf %481, %496 : vector<8x128xf32>
    %c31 = arith.constant 31 : index
    %498 = memref.load %arg1[%c31] : memref<50xf32, #tpu.memory_space<smem>>
    %499 = vector.broadcast %498 : f32 to vector<8x128xf32>
    %500 = arith.mulf %0, %499 : vector<8x128xf32>
    %c31_126 = arith.constant 31 : index
    %501 = memref.load %arg2[%c31_126] : memref<50xf32, #tpu.memory_space<smem>>
    %502 = vector.broadcast %501 : f32 to vector<8x128xf32>
    %503 = arith.addf %500, %502 : vector<8x128xf32>
    %cst_127 = arith.constant 0.000000e+00 : f32
    %504 = vector.broadcast %cst_127 : f32 to vector<8x128xf32>
    %505 = arith.subf %504, %503 : vector<8x128xf32>
    %506 = math.exp %505 : vector<8x128xf32>
    %cst_128 = arith.constant 1.000000e+00 : f32
    %507 = vector.broadcast %cst_128 : f32 to vector<8x128xf32>
    %508 = arith.addf %507, %506 : vector<8x128xf32>
    %509 = tpu.reciprocal %508 {approx = true} : vector<8x128xf32> -> vector<8x128xf32>
    %c31_129 = arith.constant 31 : index
    %510 = memref.load %arg3[%c31_129] : memref<50xf32, #tpu.memory_space<smem>>
    %511 = vector.broadcast %510 : f32 to vector<8x128xf32>
    %512 = arith.mulf %509, %511 : vector<8x128xf32>
    %513 = arith.addf %497, %512 : vector<8x128xf32>
    %c32 = arith.constant 32 : index
    %514 = memref.load %arg1[%c32] : memref<50xf32, #tpu.memory_space<smem>>
    %515 = vector.broadcast %514 : f32 to vector<8x128xf32>
    %516 = arith.mulf %0, %515 : vector<8x128xf32>
    %c32_130 = arith.constant 32 : index
    %517 = memref.load %arg2[%c32_130] : memref<50xf32, #tpu.memory_space<smem>>
    %518 = vector.broadcast %517 : f32 to vector<8x128xf32>
    %519 = arith.addf %516, %518 : vector<8x128xf32>
    %cst_131 = arith.constant 0.000000e+00 : f32
    %520 = vector.broadcast %cst_131 : f32 to vector<8x128xf32>
    %521 = arith.subf %520, %519 : vector<8x128xf32>
    %522 = math.exp %521 : vector<8x128xf32>
    %cst_132 = arith.constant 1.000000e+00 : f32
    %523 = vector.broadcast %cst_132 : f32 to vector<8x128xf32>
    %524 = arith.addf %523, %522 : vector<8x128xf32>
    %525 = tpu.reciprocal %524 {approx = true} : vector<8x128xf32> -> vector<8x128xf32>
    %c32_133 = arith.constant 32 : index
    %526 = memref.load %arg3[%c32_133] : memref<50xf32, #tpu.memory_space<smem>>
    %527 = vector.broadcast %526 : f32 to vector<8x128xf32>
    %528 = arith.mulf %525, %527 : vector<8x128xf32>
    %529 = arith.addf %513, %528 : vector<8x128xf32>
    %c33 = arith.constant 33 : index
    %530 = memref.load %arg1[%c33] : memref<50xf32, #tpu.memory_space<smem>>
    %531 = vector.broadcast %530 : f32 to vector<8x128xf32>
    %532 = arith.mulf %0, %531 : vector<8x128xf32>
    %c33_134 = arith.constant 33 : index
    %533 = memref.load %arg2[%c33_134] : memref<50xf32, #tpu.memory_space<smem>>
    %534 = vector.broadcast %533 : f32 to vector<8x128xf32>
    %535 = arith.addf %532, %534 : vector<8x128xf32>
    %cst_135 = arith.constant 0.000000e+00 : f32
    %536 = vector.broadcast %cst_135 : f32 to vector<8x128xf32>
    %537 = arith.subf %536, %535 : vector<8x128xf32>
    %538 = math.exp %537 : vector<8x128xf32>
    %cst_136 = arith.constant 1.000000e+00 : f32
    %539 = vector.broadcast %cst_136 : f32 to vector<8x128xf32>
    %540 = arith.addf %539, %538 : vector<8x128xf32>
    %541 = tpu.reciprocal %540 {approx = true} : vector<8x128xf32> -> vector<8x128xf32>
    %c33_137 = arith.constant 33 : index
    %542 = memref.load %arg3[%c33_137] : memref<50xf32, #tpu.memory_space<smem>>
    %543 = vector.broadcast %542 : f32 to vector<8x128xf32>
    %544 = arith.mulf %541, %543 : vector<8x128xf32>
    %545 = arith.addf %529, %544 : vector<8x128xf32>
    %c34 = arith.constant 34 : index
    %546 = memref.load %arg1[%c34] : memref<50xf32, #tpu.memory_space<smem>>
    %547 = vector.broadcast %546 : f32 to vector<8x128xf32>
    %548 = arith.mulf %0, %547 : vector<8x128xf32>
    %c34_138 = arith.constant 34 : index
    %549 = memref.load %arg2[%c34_138] : memref<50xf32, #tpu.memory_space<smem>>
    %550 = vector.broadcast %549 : f32 to vector<8x128xf32>
    %551 = arith.addf %548, %550 : vector<8x128xf32>
    %cst_139 = arith.constant 0.000000e+00 : f32
    %552 = vector.broadcast %cst_139 : f32 to vector<8x128xf32>
    %553 = arith.subf %552, %551 : vector<8x128xf32>
    %554 = math.exp %553 : vector<8x128xf32>
    %cst_140 = arith.constant 1.000000e+00 : f32
    %555 = vector.broadcast %cst_140 : f32 to vector<8x128xf32>
    %556 = arith.addf %555, %554 : vector<8x128xf32>
    %557 = tpu.reciprocal %556 {approx = true} : vector<8x128xf32> -> vector<8x128xf32>
    %c34_141 = arith.constant 34 : index
    %558 = memref.load %arg3[%c34_141] : memref<50xf32, #tpu.memory_space<smem>>
    %559 = vector.broadcast %558 : f32 to vector<8x128xf32>
    %560 = arith.mulf %557, %559 : vector<8x128xf32>
    %561 = arith.addf %545, %560 : vector<8x128xf32>
    %c35 = arith.constant 35 : index
    %562 = memref.load %arg1[%c35] : memref<50xf32, #tpu.memory_space<smem>>
    %563 = vector.broadcast %562 : f32 to vector<8x128xf32>
    %564 = arith.mulf %0, %563 : vector<8x128xf32>
    %c35_142 = arith.constant 35 : index
    %565 = memref.load %arg2[%c35_142] : memref<50xf32, #tpu.memory_space<smem>>
    %566 = vector.broadcast %565 : f32 to vector<8x128xf32>
    %567 = arith.addf %564, %566 : vector<8x128xf32>
    %cst_143 = arith.constant 0.000000e+00 : f32
    %568 = vector.broadcast %cst_143 : f32 to vector<8x128xf32>
    %569 = arith.subf %568, %567 : vector<8x128xf32>
    %570 = math.exp %569 : vector<8x128xf32>
    %cst_144 = arith.constant 1.000000e+00 : f32
    %571 = vector.broadcast %cst_144 : f32 to vector<8x128xf32>
    %572 = arith.addf %571, %570 : vector<8x128xf32>
    %573 = tpu.reciprocal %572 {approx = true} : vector<8x128xf32> -> vector<8x128xf32>
    %c35_145 = arith.constant 35 : index
    %574 = memref.load %arg3[%c35_145] : memref<50xf32, #tpu.memory_space<smem>>
    %575 = vector.broadcast %574 : f32 to vector<8x128xf32>
    %576 = arith.mulf %573, %575 : vector<8x128xf32>
    %577 = arith.addf %561, %576 : vector<8x128xf32>
    %c36 = arith.constant 36 : index
    %578 = memref.load %arg1[%c36] : memref<50xf32, #tpu.memory_space<smem>>
    %579 = vector.broadcast %578 : f32 to vector<8x128xf32>
    %580 = arith.mulf %0, %579 : vector<8x128xf32>
    %c36_146 = arith.constant 36 : index
    %581 = memref.load %arg2[%c36_146] : memref<50xf32, #tpu.memory_space<smem>>
    %582 = vector.broadcast %581 : f32 to vector<8x128xf32>
    %583 = arith.addf %580, %582 : vector<8x128xf32>
    %cst_147 = arith.constant 0.000000e+00 : f32
    %584 = vector.broadcast %cst_147 : f32 to vector<8x128xf32>
    %585 = arith.subf %584, %583 : vector<8x128xf32>
    %586 = math.exp %585 : vector<8x128xf32>
    %cst_148 = arith.constant 1.000000e+00 : f32
    %587 = vector.broadcast %cst_148 : f32 to vector<8x128xf32>
    %588 = arith.addf %587, %586 : vector<8x128xf32>
    %589 = tpu.reciprocal %588 {approx = true} : vector<8x128xf32> -> vector<8x128xf32>
    %c36_149 = arith.constant 36 : index
    %590 = memref.load %arg3[%c36_149] : memref<50xf32, #tpu.memory_space<smem>>
    %591 = vector.broadcast %590 : f32 to vector<8x128xf32>
    %592 = arith.mulf %589, %591 : vector<8x128xf32>
    %593 = arith.addf %577, %592 : vector<8x128xf32>
    %c37 = arith.constant 37 : index
    %594 = memref.load %arg1[%c37] : memref<50xf32, #tpu.memory_space<smem>>
    %595 = vector.broadcast %594 : f32 to vector<8x128xf32>
    %596 = arith.mulf %0, %595 : vector<8x128xf32>
    %c37_150 = arith.constant 37 : index
    %597 = memref.load %arg2[%c37_150] : memref<50xf32, #tpu.memory_space<smem>>
    %598 = vector.broadcast %597 : f32 to vector<8x128xf32>
    %599 = arith.addf %596, %598 : vector<8x128xf32>
    %cst_151 = arith.constant 0.000000e+00 : f32
    %600 = vector.broadcast %cst_151 : f32 to vector<8x128xf32>
    %601 = arith.subf %600, %599 : vector<8x128xf32>
    %602 = math.exp %601 : vector<8x128xf32>
    %cst_152 = arith.constant 1.000000e+00 : f32
    %603 = vector.broadcast %cst_152 : f32 to vector<8x128xf32>
    %604 = arith.addf %603, %602 : vector<8x128xf32>
    %605 = tpu.reciprocal %604 {approx = true} : vector<8x128xf32> -> vector<8x128xf32>
    %c37_153 = arith.constant 37 : index
    %606 = memref.load %arg3[%c37_153] : memref<50xf32, #tpu.memory_space<smem>>
    %607 = vector.broadcast %606 : f32 to vector<8x128xf32>
    %608 = arith.mulf %605, %607 : vector<8x128xf32>
    %609 = arith.addf %593, %608 : vector<8x128xf32>
    %c38 = arith.constant 38 : index
    %610 = memref.load %arg1[%c38] : memref<50xf32, #tpu.memory_space<smem>>
    %611 = vector.broadcast %610 : f32 to vector<8x128xf32>
    %612 = arith.mulf %0, %611 : vector<8x128xf32>
    %c38_154 = arith.constant 38 : index
    %613 = memref.load %arg2[%c38_154] : memref<50xf32, #tpu.memory_space<smem>>
    %614 = vector.broadcast %613 : f32 to vector<8x128xf32>
    %615 = arith.addf %612, %614 : vector<8x128xf32>
    %cst_155 = arith.constant 0.000000e+00 : f32
    %616 = vector.broadcast %cst_155 : f32 to vector<8x128xf32>
    %617 = arith.subf %616, %615 : vector<8x128xf32>
    %618 = math.exp %617 : vector<8x128xf32>
    %cst_156 = arith.constant 1.000000e+00 : f32
    %619 = vector.broadcast %cst_156 : f32 to vector<8x128xf32>
    %620 = arith.addf %619, %618 : vector<8x128xf32>
    %621 = tpu.reciprocal %620 {approx = true} : vector<8x128xf32> -> vector<8x128xf32>
    %c38_157 = arith.constant 38 : index
    %622 = memref.load %arg3[%c38_157] : memref<50xf32, #tpu.memory_space<smem>>
    %623 = vector.broadcast %622 : f32 to vector<8x128xf32>
    %624 = arith.mulf %621, %623 : vector<8x128xf32>
    %625 = arith.addf %609, %624 : vector<8x128xf32>
    %c39 = arith.constant 39 : index
    %626 = memref.load %arg1[%c39] : memref<50xf32, #tpu.memory_space<smem>>
    %627 = vector.broadcast %626 : f32 to vector<8x128xf32>
    %628 = arith.mulf %0, %627 : vector<8x128xf32>
    %c39_158 = arith.constant 39 : index
    %629 = memref.load %arg2[%c39_158] : memref<50xf32, #tpu.memory_space<smem>>
    %630 = vector.broadcast %629 : f32 to vector<8x128xf32>
    %631 = arith.addf %628, %630 : vector<8x128xf32>
    %cst_159 = arith.constant 0.000000e+00 : f32
    %632 = vector.broadcast %cst_159 : f32 to vector<8x128xf32>
    %633 = arith.subf %632, %631 : vector<8x128xf32>
    %634 = math.exp %633 : vector<8x128xf32>
    %cst_160 = arith.constant 1.000000e+00 : f32
    %635 = vector.broadcast %cst_160 : f32 to vector<8x128xf32>
    %636 = arith.addf %635, %634 : vector<8x128xf32>
    %637 = tpu.reciprocal %636 {approx = true} : vector<8x128xf32> -> vector<8x128xf32>
    %c39_161 = arith.constant 39 : index
    %638 = memref.load %arg3[%c39_161] : memref<50xf32, #tpu.memory_space<smem>>
    %639 = vector.broadcast %638 : f32 to vector<8x128xf32>
    %640 = arith.mulf %637, %639 : vector<8x128xf32>
    %641 = arith.addf %625, %640 : vector<8x128xf32>
    %c40 = arith.constant 40 : index
    %642 = memref.load %arg1[%c40] : memref<50xf32, #tpu.memory_space<smem>>
    %643 = vector.broadcast %642 : f32 to vector<8x128xf32>
    %644 = arith.mulf %0, %643 : vector<8x128xf32>
    %c40_162 = arith.constant 40 : index
    %645 = memref.load %arg2[%c40_162] : memref<50xf32, #tpu.memory_space<smem>>
    %646 = vector.broadcast %645 : f32 to vector<8x128xf32>
    %647 = arith.addf %644, %646 : vector<8x128xf32>
    %cst_163 = arith.constant 0.000000e+00 : f32
    %648 = vector.broadcast %cst_163 : f32 to vector<8x128xf32>
    %649 = arith.subf %648, %647 : vector<8x128xf32>
    %650 = math.exp %649 : vector<8x128xf32>
    %cst_164 = arith.constant 1.000000e+00 : f32
    %651 = vector.broadcast %cst_164 : f32 to vector<8x128xf32>
    %652 = arith.addf %651, %650 : vector<8x128xf32>
    %653 = tpu.reciprocal %652 {approx = true} : vector<8x128xf32> -> vector<8x128xf32>
    %c40_165 = arith.constant 40 : index
    %654 = memref.load %arg3[%c40_165] : memref<50xf32, #tpu.memory_space<smem>>
    %655 = vector.broadcast %654 : f32 to vector<8x128xf32>
    %656 = arith.mulf %653, %655 : vector<8x128xf32>
    %657 = arith.addf %641, %656 : vector<8x128xf32>
    %c41 = arith.constant 41 : index
    %658 = memref.load %arg1[%c41] : memref<50xf32, #tpu.memory_space<smem>>
    %659 = vector.broadcast %658 : f32 to vector<8x128xf32>
    %660 = arith.mulf %0, %659 : vector<8x128xf32>
    %c41_166 = arith.constant 41 : index
    %661 = memref.load %arg2[%c41_166] : memref<50xf32, #tpu.memory_space<smem>>
    %662 = vector.broadcast %661 : f32 to vector<8x128xf32>
    %663 = arith.addf %660, %662 : vector<8x128xf32>
    %cst_167 = arith.constant 0.000000e+00 : f32
    %664 = vector.broadcast %cst_167 : f32 to vector<8x128xf32>
    %665 = arith.subf %664, %663 : vector<8x128xf32>
    %666 = math.exp %665 : vector<8x128xf32>
    %cst_168 = arith.constant 1.000000e+00 : f32
    %667 = vector.broadcast %cst_168 : f32 to vector<8x128xf32>
    %668 = arith.addf %667, %666 : vector<8x128xf32>
    %669 = tpu.reciprocal %668 {approx = true} : vector<8x128xf32> -> vector<8x128xf32>
    %c41_169 = arith.constant 41 : index
    %670 = memref.load %arg3[%c41_169] : memref<50xf32, #tpu.memory_space<smem>>
    %671 = vector.broadcast %670 : f32 to vector<8x128xf32>
    %672 = arith.mulf %669, %671 : vector<8x128xf32>
    %673 = arith.addf %657, %672 : vector<8x128xf32>
    %c42 = arith.constant 42 : index
    %674 = memref.load %arg1[%c42] : memref<50xf32, #tpu.memory_space<smem>>
    %675 = vector.broadcast %674 : f32 to vector<8x128xf32>
    %676 = arith.mulf %0, %675 : vector<8x128xf32>
    %c42_170 = arith.constant 42 : index
    %677 = memref.load %arg2[%c42_170] : memref<50xf32, #tpu.memory_space<smem>>
    %678 = vector.broadcast %677 : f32 to vector<8x128xf32>
    %679 = arith.addf %676, %678 : vector<8x128xf32>
    %cst_171 = arith.constant 0.000000e+00 : f32
    %680 = vector.broadcast %cst_171 : f32 to vector<8x128xf32>
    %681 = arith.subf %680, %679 : vector<8x128xf32>
    %682 = math.exp %681 : vector<8x128xf32>
    %cst_172 = arith.constant 1.000000e+00 : f32
    %683 = vector.broadcast %cst_172 : f32 to vector<8x128xf32>
    %684 = arith.addf %683, %682 : vector<8x128xf32>
    %685 = tpu.reciprocal %684 {approx = true} : vector<8x128xf32> -> vector<8x128xf32>
    %c42_173 = arith.constant 42 : index
    %686 = memref.load %arg3[%c42_173] : memref<50xf32, #tpu.memory_space<smem>>
    %687 = vector.broadcast %686 : f32 to vector<8x128xf32>
    %688 = arith.mulf %685, %687 : vector<8x128xf32>
    %689 = arith.addf %673, %688 : vector<8x128xf32>
    %c43 = arith.constant 43 : index
    %690 = memref.load %arg1[%c43] : memref<50xf32, #tpu.memory_space<smem>>
    %691 = vector.broadcast %690 : f32 to vector<8x128xf32>
    %692 = arith.mulf %0, %691 : vector<8x128xf32>
    %c43_174 = arith.constant 43 : index
    %693 = memref.load %arg2[%c43_174] : memref<50xf32, #tpu.memory_space<smem>>
    %694 = vector.broadcast %693 : f32 to vector<8x128xf32>
    %695 = arith.addf %692, %694 : vector<8x128xf32>
    %cst_175 = arith.constant 0.000000e+00 : f32
    %696 = vector.broadcast %cst_175 : f32 to vector<8x128xf32>
    %697 = arith.subf %696, %695 : vector<8x128xf32>
    %698 = math.exp %697 : vector<8x128xf32>
    %cst_176 = arith.constant 1.000000e+00 : f32
    %699 = vector.broadcast %cst_176 : f32 to vector<8x128xf32>
    %700 = arith.addf %699, %698 : vector<8x128xf32>
    %701 = tpu.reciprocal %700 {approx = true} : vector<8x128xf32> -> vector<8x128xf32>
    %c43_177 = arith.constant 43 : index
    %702 = memref.load %arg3[%c43_177] : memref<50xf32, #tpu.memory_space<smem>>
    %703 = vector.broadcast %702 : f32 to vector<8x128xf32>
    %704 = arith.mulf %701, %703 : vector<8x128xf32>
    %705 = arith.addf %689, %704 : vector<8x128xf32>
    %c44 = arith.constant 44 : index
    %706 = memref.load %arg1[%c44] : memref<50xf32, #tpu.memory_space<smem>>
    %707 = vector.broadcast %706 : f32 to vector<8x128xf32>
    %708 = arith.mulf %0, %707 : vector<8x128xf32>
    %c44_178 = arith.constant 44 : index
    %709 = memref.load %arg2[%c44_178] : memref<50xf32, #tpu.memory_space<smem>>
    %710 = vector.broadcast %709 : f32 to vector<8x128xf32>
    %711 = arith.addf %708, %710 : vector<8x128xf32>
    %cst_179 = arith.constant 0.000000e+00 : f32
    %712 = vector.broadcast %cst_179 : f32 to vector<8x128xf32>
    %713 = arith.subf %712, %711 : vector<8x128xf32>
    %714 = math.exp %713 : vector<8x128xf32>
    %cst_180 = arith.constant 1.000000e+00 : f32
    %715 = vector.broadcast %cst_180 : f32 to vector<8x128xf32>
    %716 = arith.addf %715, %714 : vector<8x128xf32>
    %717 = tpu.reciprocal %716 {approx = true} : vector<8x128xf32> -> vector<8x128xf32>
    %c44_181 = arith.constant 44 : index
    %718 = memref.load %arg3[%c44_181] : memref<50xf32, #tpu.memory_space<smem>>
    %719 = vector.broadcast %718 : f32 to vector<8x128xf32>
    %720 = arith.mulf %717, %719 : vector<8x128xf32>
    %721 = arith.addf %705, %720 : vector<8x128xf32>
    %c45 = arith.constant 45 : index
    %722 = memref.load %arg1[%c45] : memref<50xf32, #tpu.memory_space<smem>>
    %723 = vector.broadcast %722 : f32 to vector<8x128xf32>
    %724 = arith.mulf %0, %723 : vector<8x128xf32>
    %c45_182 = arith.constant 45 : index
    %725 = memref.load %arg2[%c45_182] : memref<50xf32, #tpu.memory_space<smem>>
    %726 = vector.broadcast %725 : f32 to vector<8x128xf32>
    %727 = arith.addf %724, %726 : vector<8x128xf32>
    %cst_183 = arith.constant 0.000000e+00 : f32
    %728 = vector.broadcast %cst_183 : f32 to vector<8x128xf32>
    %729 = arith.subf %728, %727 : vector<8x128xf32>
    %730 = math.exp %729 : vector<8x128xf32>
    %cst_184 = arith.constant 1.000000e+00 : f32
    %731 = vector.broadcast %cst_184 : f32 to vector<8x128xf32>
    %732 = arith.addf %731, %730 : vector<8x128xf32>
    %733 = tpu.reciprocal %732 {approx = true} : vector<8x128xf32> -> vector<8x128xf32>
    %c45_185 = arith.constant 45 : index
    %734 = memref.load %arg3[%c45_185] : memref<50xf32, #tpu.memory_space<smem>>
    %735 = vector.broadcast %734 : f32 to vector<8x128xf32>
    %736 = arith.mulf %733, %735 : vector<8x128xf32>
    %737 = arith.addf %721, %736 : vector<8x128xf32>
    %c46 = arith.constant 46 : index
    %738 = memref.load %arg1[%c46] : memref<50xf32, #tpu.memory_space<smem>>
    %739 = vector.broadcast %738 : f32 to vector<8x128xf32>
    %740 = arith.mulf %0, %739 : vector<8x128xf32>
    %c46_186 = arith.constant 46 : index
    %741 = memref.load %arg2[%c46_186] : memref<50xf32, #tpu.memory_space<smem>>
    %742 = vector.broadcast %741 : f32 to vector<8x128xf32>
    %743 = arith.addf %740, %742 : vector<8x128xf32>
    %cst_187 = arith.constant 0.000000e+00 : f32
    %744 = vector.broadcast %cst_187 : f32 to vector<8x128xf32>
    %745 = arith.subf %744, %743 : vector<8x128xf32>
    %746 = math.exp %745 : vector<8x128xf32>
    %cst_188 = arith.constant 1.000000e+00 : f32
    %747 = vector.broadcast %cst_188 : f32 to vector<8x128xf32>
    %748 = arith.addf %747, %746 : vector<8x128xf32>
    %749 = tpu.reciprocal %748 {approx = true} : vector<8x128xf32> -> vector<8x128xf32>
    %c46_189 = arith.constant 46 : index
    %750 = memref.load %arg3[%c46_189] : memref<50xf32, #tpu.memory_space<smem>>
    %751 = vector.broadcast %750 : f32 to vector<8x128xf32>
    %752 = arith.mulf %749, %751 : vector<8x128xf32>
    %753 = arith.addf %737, %752 : vector<8x128xf32>
    %c47 = arith.constant 47 : index
    %754 = memref.load %arg1[%c47] : memref<50xf32, #tpu.memory_space<smem>>
    %755 = vector.broadcast %754 : f32 to vector<8x128xf32>
    %756 = arith.mulf %0, %755 : vector<8x128xf32>
    %c47_190 = arith.constant 47 : index
    %757 = memref.load %arg2[%c47_190] : memref<50xf32, #tpu.memory_space<smem>>
    %758 = vector.broadcast %757 : f32 to vector<8x128xf32>
    %759 = arith.addf %756, %758 : vector<8x128xf32>
    %cst_191 = arith.constant 0.000000e+00 : f32
    %760 = vector.broadcast %cst_191 : f32 to vector<8x128xf32>
    %761 = arith.subf %760, %759 : vector<8x128xf32>
    %762 = math.exp %761 : vector<8x128xf32>
    %cst_192 = arith.constant 1.000000e+00 : f32
    %763 = vector.broadcast %cst_192 : f32 to vector<8x128xf32>
    %764 = arith.addf %763, %762 : vector<8x128xf32>
    %765 = tpu.reciprocal %764 {approx = true} : vector<8x128xf32> -> vector<8x128xf32>
    %c47_193 = arith.constant 47 : index
    %766 = memref.load %arg3[%c47_193] : memref<50xf32, #tpu.memory_space<smem>>
    %767 = vector.broadcast %766 : f32 to vector<8x128xf32>
    %768 = arith.mulf %765, %767 : vector<8x128xf32>
    %769 = arith.addf %753, %768 : vector<8x128xf32>
    %c48 = arith.constant 48 : index
    %770 = memref.load %arg1[%c48] : memref<50xf32, #tpu.memory_space<smem>>
    %771 = vector.broadcast %770 : f32 to vector<8x128xf32>
    %772 = arith.mulf %0, %771 : vector<8x128xf32>
    %c48_194 = arith.constant 48 : index
    %773 = memref.load %arg2[%c48_194] : memref<50xf32, #tpu.memory_space<smem>>
    %774 = vector.broadcast %773 : f32 to vector<8x128xf32>
    %775 = arith.addf %772, %774 : vector<8x128xf32>
    %cst_195 = arith.constant 0.000000e+00 : f32
    %776 = vector.broadcast %cst_195 : f32 to vector<8x128xf32>
    %777 = arith.subf %776, %775 : vector<8x128xf32>
    %778 = math.exp %777 : vector<8x128xf32>
    %cst_196 = arith.constant 1.000000e+00 : f32
    %779 = vector.broadcast %cst_196 : f32 to vector<8x128xf32>
    %780 = arith.addf %779, %778 : vector<8x128xf32>
    %781 = tpu.reciprocal %780 {approx = true} : vector<8x128xf32> -> vector<8x128xf32>
    %c48_197 = arith.constant 48 : index
    %782 = memref.load %arg3[%c48_197] : memref<50xf32, #tpu.memory_space<smem>>
    %783 = vector.broadcast %782 : f32 to vector<8x128xf32>
    %784 = arith.mulf %781, %783 : vector<8x128xf32>
    %785 = arith.addf %769, %784 : vector<8x128xf32>
    %c49 = arith.constant 49 : index
    %786 = memref.load %arg1[%c49] : memref<50xf32, #tpu.memory_space<smem>>
    %787 = vector.broadcast %786 : f32 to vector<8x128xf32>
    %788 = arith.mulf %0, %787 : vector<8x128xf32>
    %c49_198 = arith.constant 49 : index
    %789 = memref.load %arg2[%c49_198] : memref<50xf32, #tpu.memory_space<smem>>
    %790 = vector.broadcast %789 : f32 to vector<8x128xf32>
    %791 = arith.addf %788, %790 : vector<8x128xf32>
    %cst_199 = arith.constant 0.000000e+00 : f32
    %792 = vector.broadcast %cst_199 : f32 to vector<8x128xf32>
    %793 = arith.subf %792, %791 : vector<8x128xf32>
    %794 = math.exp %793 : vector<8x128xf32>
    %cst_200 = arith.constant 1.000000e+00 : f32
    %795 = vector.broadcast %cst_200 : f32 to vector<8x128xf32>
    %796 = arith.addf %795, %794 : vector<8x128xf32>
    %797 = tpu.reciprocal %796 {approx = true} : vector<8x128xf32> -> vector<8x128xf32>
    %c49_201 = arith.constant 49 : index
    %798 = memref.load %arg3[%c49_201] : memref<50xf32, #tpu.memory_space<smem>>
    %799 = vector.broadcast %798 : f32 to vector<8x128xf32>
    %800 = arith.mulf %797, %799 : vector<8x128xf32>
    %801 = arith.addf %785, %800 : vector<8x128xf32>
    %c0_202 = arith.constant 0 : index
    %802 = memref.load %arg4[%c0_202] : memref<1xf32, #tpu.memory_space<smem>>
    %803 = vector.broadcast %802 : f32 to vector<8x128xf32>
    %804 = arith.addf %801, %803 : vector<8x128xf32>
    %c0_203 = arith.constant 0 : index
    %c0_204 = arith.constant 0 : index
    %805 = vector.load %arg6[%c0_203, %c0_204] : memref<8x128xf32, #tpu.memory_space<vmem>>, vector<8x128xf32>
    tpu.vector_store %arg6[%c0_203, %c0_204], %804 {strides = array<i32>} : memref<8x128xf32, #tpu.memory_space<vmem>>, vector<8x128xf32>,
    return
  }
  func.func @transform_0(%arg0: i32) -> i32 {
    %c0_i32 = arith.constant 0 : i32
    %c0_i32_0 = arith.constant 0 : i32
    return %c0_i32 : i32
  }
  func.func @transform_1(%arg0: i32) -> i32 {
    %c0_i32 = arith.constant 0 : i32
    %c0_i32_0 = arith.constant 0 : i32
    return %c0_i32 : i32
  }
  func.func @transform_2(%arg0: i32) -> i32 {
    %c0_i32 = arith.constant 0 : i32
    %c0_i32_0 = arith.constant 0 : i32
    return %c0_i32 : i32
  }
  func.func @transform_3(%arg0: i32) -> i32 {
    %c0_i32 = arith.constant 0 : i32
    %c0_i32_0 = arith.constant 0 : i32
    return %c0_i32 : i32
  }
  func.func @transform_4(%arg0: i32) -> (i32, i32) {
    %c0_i32 = arith.constant 0 : i32
    %c0_i32_0 = arith.constant 0 : i32
    return %arg0, %c0_i32 : i32, i32
  }
  func.func @transform_5(%arg0: i32) -> (i32, i32) {
    %c0_i32 = arith.constant 0 : i32
    %c0_i32_0 = arith.constant 0 : i32
    return %arg0, %c0_i32 : i32, i32
  }
}

</mosaic_0001>

<bundles_post_ra>
// kernel: tpu_custom_call.1
= control target key start
LH: loop header
LB: loop body
LE: loop exit
PB: predicated region body
PF: predicated region fallthrough
CT: control target
= control target key end

     0   :  { %11 = vsyncpa [#allocation5], 0  ;;  %s1789_s0 = inlined_call_operand.vmem [shape: f32[50], index: 0, kind: input, shape index: {}]   ;;  %s1790_s1 = inlined_call_operand.vmem [shape: f32[50], index: 1, kind: input, shape index: {}]   ;;  %s1791_s2 = inlined_call_operand.vmem [shape: f32[50], index: 2, kind: input, shape index: {}]   ;;  %s1792_s3 = inlined_call_operand.<no memory space> [shape: f32[1], index: 3, kind: input, shape index: {}]   ;;  %s1793_s4 = inlined_call_operand.vmem [shape: f32[8,128], index: 4, kind: input, shape index: {}]   ;;  %s1794_s5 = inlined_call_operand.hbm [shape: f32[8,128], index: 5, kind: output, shape index: {}]  }
   0x1   :  { %12 = vsyncpa [#allocation7], 0  ;;  %s30_s20 = sshll.u32 %s1790_s1, 4  ;;  %s31_s20 = int_to_ptr.vmem [resolvable:$true] %s30_s20 }
   0x2   :  { %13 = vsyncpa [#allocation4], 0  ;;  %s20_s23 = sshll.u32 %s1789_s0, 4  ;;  %s1181_s24 = scalar_lea.vmem %s31_s20, 16  ;;  %s21_s23 = int_to_ptr.vmem [resolvable:$true] %s20_s23 }
   0x3   :  { %p1182_p0 = scmp.ne.s32.totalorder %s31_s20, %s1181_s24  ;;  %p1186_p1 = scmp.lt.s32.totalorder %s31_s20, %s31_s20 }
   0x4   :  { %p1187_p2 = scmp.lt.s32.totalorder %s1181_s24, %s1181_s24 }
   0x6   :  { %p1188_p3 = por %p1187_p2, %p1186_p1 }
   0x8   :  { %p1189_p4 = pnand %p1188_p3, %p1182_p0 }
   0xa   :  { %1192 = shalt.err (!%p1189_p4)
}
   0xb   :  { %s1245_s25 = smov [#allocation6]   ;;  %s1193_s26 = scalar_lea.vmem %s21_s23, 16 }
   0xc   :  { %33 = dma.vmem_to_smem %s31_s20, 16, %s1245_s25, [#allocation7]  }
   0xd   :  { %p1194_p5 = scmp.ne.s32.totalorder %s21_s23, %s1193_s26  ;;  %p1198_p6 = scmp.lt.s32.totalorder %s21_s23, %s21_s23 }
   0xe   :  { %p1199_p7 = scmp.lt.s32.totalorder %s1193_s26, %s1193_s26 }
  0x10   :  { %p1200_p8 = por %p1199_p7, %p1198_p6 }
  0x12   :  { %p1201_p9 = pnand %p1200_p8, %p1194_p5 }
  0x14   :  { %1204 = shalt.err (!%p1201_p9)
}
  0x15   :  { %s1246_s1 = smov [#allocation3]   ;;  %s40_s28 = sshll.u32 %s1791_s2, 4  ;;  %s41_s28 = int_to_ptr.vmem [resolvable:$true] %s40_s28 }
  0x16   :  { %23 = dma.vmem_to_smem %s21_s23, 16, %s1246_s1, [#allocation5]  }
  0x17   :  { %s1205_s29 = scalar_lea.vmem %s41_s28, 16  ;;  %p1210_p11 = scmp.lt.s32.totalorder %s41_s28, %s41_s28 }
  0x18   :  { %p1206_p10 = scmp.ne.s32.totalorder %s41_s28, %s1205_s29  ;;  %p1211_p12 = scmp.lt.s32.totalorder %s1205_s29, %s1205_s29 }
  0x1a   :  { %p1212_p13 = por %p1211_p12, %p1210_p11 }
  0x1c   :  { %p1213_p0 = pnand %p1212_p13, %p1206_p10 }
  0x1e   :  { %1216 = shalt.err (!%p1213_p0)
}
  0x1f   :  { %s1247_s30 = smov [#allocation8]  }
  0x20   :  { %43 = dma.vmem_to_smem %s41_s28, 16, %s1247_s30, [#allocation7]  }
  0x21   :  { %1239 = dma.done.wait [#allocation5], 16  }
  0x22   :  { %1240 = vsyncadd [#allocation5], 4294967280 }
  0x23   :  { %1241 = dma.done.wait [#allocation7], 32  }
  0x24   :  { %1242 = vsyncadd [#allocation7], 4294967264 }
  0x25   :  { %57 = sfence }
  0x26   :  { %s59_s6 = sld [smem:[#allocation3]]  ;;  %s829_s8 = sld [smem:[#allocation3 + $0x1]]  ;;  %v1291_v0 = vld [vmem:[%s1793_s4] sm:$0xff] }
  0x27   :  { %s62_s7 = sld [smem:[#allocation6]]  ;;  %s830_s9 = sld [smem:[#allocation6 + $0x1]] }
  0x28   :  { %s832_s2 = sld [smem:[#allocation3 + $0x2]]  ;;  %s835_s13 = sld [smem:[#allocation3 + $0x3]] }
  0x29   :  { %s833_s10 = sld [smem:[#allocation6 + $0x2]]  ;;  %s1293_s14 = sld [smem:[#allocation6 + $0x3]] }
  0x2a   :  { %s838_s15 = sld [smem:[#allocation3 + $0x4]]  ;;  %s1298_s17 = sld [smem:[#allocation3 + $0x5]] }
  0x2b   :  { %s1295_s16 = sld [smem:[#allocation6 + $0x4]]  ;;  %s1301_s18 = sld [smem:[#allocation6 + $0x5]] }
  0x2c   :  { %v60_v1 = vstv %s59_s6  ;;  %v75_v4 = vstv %s829_s8  ;;  %s1303_s19 = sld [smem:[#allocation3 + $0x6]]  ;;  %s1308_s21 = sld [smem:[#allocation3 + $0x7]] }
  0x2d   :  { %v63_v2 = vstv %s62_s7  ;;  %v61_v3 = vmul.f32 %v60_v1, %v1291_v0  ;;  %v76_v5 = vmul.f32 %v75_v4, %v1291_v0  ;;  %v78_v6 = vstv %s830_s9  ;;  %s1306_s20 = sld [smem:[#allocation6 + $0x6]]  ;;  %s1313_s22 = sld [smem:[#allocation6 + $0x7]] }
  0x2e   :  { %v90_v8 = vstv %s832_s2  ;;  %v105_v12 = vstv %s835_s13  ;;  %s1315_s23 = sld [smem:[#allocation3 + $0x8]]  ;;  %s1324_s26 = sld [smem:[#allocation3 + $0x9]] }
  0x2f   :  { %v64_v7 = vadd.f32 %v63_v2, %v61_v3  ;;  %v93_v9 = vstv %s833_s10  ;;  %v79_v10 = vadd.f32 %v78_v6, %v76_v5  ;;  %v91_v11 = vmul.f32 %v90_v8, %v1291_v0  ;;  %s1317_s24 = sld [smem:[#allocation8]]  ;;  %s1326_s1 = sld [smem:[#allocation8 + $0x1]] }
  0x30   :  { %v106_v14 = vmul.f32 %v105_v12, %v1291_v0  ;;  %v108_v15 = vstv %s1293_s14  ;;  %v120_v18 = vstv %s838_s15  ;;  %s1320_s25 = sld [smem:[#allocation6 + $0x8]]  ;;  %v135_v25 = vstv %s1298_s17  ;;  %s1330_s0 = sld [smem:[#allocation6 + $0x9]] }
  0x31   :  { %v65_v13 = vsub.f32 0.0, %v64_v7  ;;  %v80_v16 = vsub.f32 0.0, %v79_v10  ;;  %v94_v17 = vadd.f32 %v93_v9, %v91_v11  ;;  %v123_v19 = vstv %s1295_s16  ;;  %s1332_s27 = sld [smem:[#allocation3 + $0xa]]  ;;  %s1341_s30 = sld [smem:[#allocation8 + $0x3]] }
  0x32   :  { %v109_v21 = vadd.f32 %v108_v15, %v106_v14  ;;  %v121_v22 = vmul.f32 %v120_v18, %v1291_v0  ;;  %v138_v26 = vstv %s1301_s18  ;;  %v136_v29 = vmul.f32 %v135_v25, %v1291_v0  ;;  %s1335_s28 = sld [smem:[#allocation8 + $0x2]]  ;;  %s1343_s6 = sld [smem:[#allocation8 + $0x4]] }
  0x33   :  { %v66_v20 = vmul.f32 1.442695, %v65_v13  ;;  %v81_v23 = vmul.f32 1.442695, %v80_v16  ;;  %v95_v24 = vsub.f32 0.0, %v94_v17  ;;  %v150_v31 = vstv %s1303_s19  ;;  %s1339_s29 = sld [smem:[#allocation6 + $0xa]] }
  0x34   :  { %v110_v27 = vsub.f32 0.0, %v109_v21  ;;  %v124_v28 = vadd.f32 %v123_v19, %v121_v22  ;;  %v139_v34 = vadd.f32 %v138_v26, %v136_v29  ;;  %v151_v35 = vmul.f32 %v150_v31, %v1291_v0  ;;  %s1348_s7 = sld [smem:[#allocation3 + $0xb]]  ;;  %s1356_s9 = sld [smem:[#allocation3 + $0xc]] }
  0x35   :  { %980 = vpow2.f32 %v66_v20  ;;  %v96_v30 = vmul.f32 1.442695, %v95_v24  ;;  %v153_v36 = vstv %s1306_s20  ;;  %v165_v37 = vstv %s1308_s21  ;;  %s1351_s8 = sld [smem:[#allocation6 + $0xb]]  ;;  %s1359_s2 = sld [smem:[#allocation6 + $0xc]] }
  0x36   :  { %982 = vpow2.f32 %v81_v23  ;;  %v111_v32 = vmul.f32 1.442695, %v110_v27  ;;  %v125_v33 = vsub.f32 0.0, %v124_v28  ;;  %v140_v39 = vsub.f32 0.0, %v139_v34  ;;  %s1365_s10 = sld [smem:[#allocation3 + $0xd]]  ;;  %s1374_s13 = sld [smem:[#allocation3 + $0xe]] }
  0x37   :  { %984 = vpow2.f32 %v96_v30  ;;  %v154_v40 = vadd.f32 %v153_v36, %v151_v35  ;;  %v166_v41 = vmul.f32 %v165_v37, %v1291_v0  ;;  %v168_v42 = vstv %s1313_s22  ;;  %s1367_s11 = sld [smem:[#allocation6 + $0xd]]  ;;  %s1379_s14 = sld [smem:[#allocation6 + $0xe]] }
  0x38   :  { %986 = vpow2.f32 %v111_v32  ;;  %v126_v38 = vmul.f32 1.442695, %v125_v33  ;;  %v180_v43 = vstv %s1315_s23  ;;  %v141_v44 = vmul.f32 1.442695, %v140_v39  ;;  %s1372_s12 = sld [smem:[#allocation8 + $0x5]]  ;;  %s1381_s15 = sld [smem:[#allocation8 + $0x6]] }
  0x39   :  { %v155_v45 = vsub.f32 0.0, %v154_v40  ;;  %v181_v46 = vmul.f32 %v180_v43, %v1291_v0  ;;  %v71_v47 = vstv %s1317_s24  ;;  %v169_v48 = vadd.f32 %v168_v42, %v166_v41  ;;  %s1385_s16 = sld [smem:[#allocation3 + $0xf]]  ;;  %s1396_s19 = sld [smem:[#allocation3 + $0x10]] }
  0x3a   :  { %988 = vpow2.f32 %v126_v38  ;;  %v183_v49 = vstv %s1320_s25  ;;  %v195_v50 = vstv %s1324_s26  ;;  %v86_v54 = vstv %s1326_s1  ;;  %s1389_s17 = sld [smem:[#allocation6 + $0xf]]  ;;  %s1400_s20 = sld [smem:[#allocation6 + $0x10]] }
  0x3b   :  { %990 = vpow2.f32 %v141_v44  ;;  %v156_v51 = vmul.f32 1.442695, %v155_v45  ;;  %v184_v52 = vadd.f32 %v183_v49, %v181_v46  ;;  %v196_v53 = vmul.f32 %v195_v50, %v1291_v0  ;;  %s1391_s18 = sld [smem:[#allocation8 + $0x7]]  ;;  %s1402_s21 = sld [smem:[#allocation8 + $0x8]] }
  0x3c   :  { %v170_v55 = vsub.f32 0.0, %v169_v48  ;;  %v198_v56 = vstv %s1330_s0  ;;  %v210_v57 = vstv %s1332_s27  ;;  %v101_v1 = vstv %s1335_s28  ;;  %s1411_s22 = sld [smem:[#allocation3 + $0x11]]  ;;  %s1421_s25 = sld [smem:[#allocation3 + $0x12]] }
  0x3d   :  { %992 = vpow2.f32 %v156_v51  ;;  %v185_v59 = vsub.f32 0.0, %v184_v52  ;;  %v199_v60 = vadd.f32 %v198_v56, %v196_v53  ;;  %v211_v61 = vmul.f32 %v210_v57, %v1291_v0  ;;  %s1413_s23 = sld [smem:[#allocation6 + $0x11]]  ;;  %s1428_s26 = sld [smem:[#allocation6 + $0x12]] }
  0x3e   :  { %v171_v2 = vmul.f32 1.442695, %v170_v55  ;;  %v213_v3 = vstv %s1339_s29  ;;  %v116_v5 = vstv %s1341_s30  ;;  %v131_v9 = vstv %s1343_s6  ;;  %s1419_s24 = sld [smem:[#allocation8 + $0x9]]  ;;  %s1430_s1 = sld [smem:[#allocation8 + $0xa]] }
  0x3f   :  { %v981_v58 = vpop.eup %980  ;;  %v200_v6 = vsub.f32 0.0, %v199_v60  ;;  %v214_v7 = vadd.f32 %v213_v3, %v211_v61  ;;  %v186_v10 = vmul.f32 1.442695, %v185_v59  ;;  %v225_v11 = vstv %s1348_s7  ;;  %s1434_s0 = sld [smem:[#allocation3 + $0x13]]  ;;  %s1447_s29 = sld [smem:[#allocation3 + $0x14]] }
  0x40   :  { %v983_v62 = vpop.eup %982  ;;  %v68_v63 = vadd.f32 1.0, %v981_v58  ;;  %v228_v15 = vstv %s1351_s8  ;;  %v226_v17 = vmul.f32 %v225_v11, %v1291_v0  ;;  %v240_v18 = vstv %s1356_s9  ;;  %s1439_s27 = sld [smem:[#allocation6 + $0x13]]  ;;  %s1454_s30 = sld [smem:[#allocation6 + $0x14]] }
  0x41   :  { %v83_v4 = vadd.f32 1.0, %v983_v62  ;;  %v985_v8 = vpop.eup %984  ;;  %v215_v14 = vsub.f32 0.0, %v214_v7  ;;  %v201_v20 = vmul.f32 1.442695, %v200_v6  ;;  %v241_v21 = vmul.f32 %v240_v18, %v1291_v0  ;;  %s1443_s28 = sld [smem:[#allocation8 + $0xb]]  ;;  %s1459_s6 = sld [smem:[#allocation8 + $0xc]] }
  0x42   :  { %994 = vrcp.f32 %v68_v63  ;;  %v987_v12 = vpop.eup %986  ;;  %v98_v13 = vadd.f32 1.0, %v985_v8  ;;  %v243_v22 = vstv %s1359_s2  ;;  %v229_v25 = vadd.f32 %v228_v15, %v226_v17  ;;  %s1462_s7 = sld [smem:[#allocation3 + $0x15]]  ;;  %s1472_s2 = sld [smem:[#allocation3 + $0x16]] }
  0x43   :  { %996 = vrcp.f32 %v83_v4  ;;  %v113_v16 = vadd.f32 1.0, %v987_v12  ;;  %v216_v24 = vmul.f32 1.442695, %v215_v14  ;;  %v244_v27 = vadd.f32 %v243_v22, %v241_v21  ;;  %s1464_s8 = sld [smem:[#allocation8 + $0xd]] }
  0x44   :  { %998 = vpow2.f32 %v171_v2  ;;  %v989_v19 = vpop.eup %988  ;;  %v255_v28 = vstv %s1365_s10  ;;  %v258_v29 = vstv %s1367_s11  ;;  %v230_v31 = vsub.f32 0.0, %v229_v25  ;;  %s1470_s9 = sld [smem:[#allocation6 + $0x15]]  ;;  %s1475_s10 = sld [smem:[#allocation8 + $0xe]] }
  0x45   :  { %1000 = vrcp.f32 %v98_v13  ;;  %v128_v23 = vadd.f32 1.0, %v989_v19  ;;  %v991_v26 = vpop.eup %990  ;;  %v256_v32 = vmul.f32 %v255_v28, %v1291_v0  ;;  %v146_v34 = vstv %s1372_s12  ;;  %s1478_s11 = sld [smem:[#allocation6 + $0x16]]  ;;  %s1484_s12 = sld [smem:[#allocation3 + $0x17]] }
  0x46   :  { %1002 = vrcp.f32 %v113_v16  ;;  %v143_v30 = vadd.f32 1.0, %v991_v26  ;;  %v245_v35 = vsub.f32 0.0, %v244_v27  ;;  %v270_v36 = vstv %s1374_s13  ;;  %s1486_s13 = sld [smem:[#allocation6 + $0x17]] }
  0x47   :  { %1004 = vpow2.f32 %v186_v10  ;;  %v993_v33 = vpop.eup %992  ;;  %v231_v38 = vmul.f32 1.442695, %v230_v31  ;;  %v259_v39 = vadd.f32 %v258_v29, %v256_v32  ;;  %v271_v41 = vmul.f32 %v270_v36, %v1291_v0 }
  0x48   :  { %1006 = vrcp.f32 %v128_v23  ;;  %v158_v37 = vadd.f32 1.0, %v993_v33  ;;  %v246_v40 = vmul.f32 1.442695, %v245_v35  ;;  %v273_v42 = vstv %s1379_s14  ;;  %s1489_s14 = sld [smem:[#allocation8 + $0xf]] }
  0x49   :  { %1008 = vpow2.f32 %v201_v20  ;;  %v161_v44 = vstv %s1381_s15  ;;  %v260_v45 = vsub.f32 0.0, %v259_v39  ;;  %v285_v46 = vstv %s1385_s16  ;;  %s1492_s15 = sld [smem:[#allocation3 + $0x18]] }
  0x4a   :  { %1010 = vrcp.f32 %v143_v30  ;;  %v274_v50 = vadd.f32 %v273_v42, %v271_v41  ;;  %v286_v51 = vmul.f32 %v285_v46, %v1291_v0  ;;  %v288_v56 = vstv %s1389_s17  ;;  %s1498_s16 = sld [smem:[#allocation6 + $0x18]]  ;;  %s1503_s17 = sld [smem:[#allocation3 + $0x19]] }
  0x4b   :  { %1012 = vpow2.f32 %v216_v24  ;;  %v261_v55 = vmul.f32 1.442695, %v260_v45  ;;  %v303_v11 = vstv %s1400_s20  ;;  %v191_v13 = vstv %s1402_s21  ;;  %s1511_s20 = sld [smem:[#allocation6 + $0x19]]  ;;  %s1514_s21 = sld [smem:[#allocation3 + $0x1a]] }
  0x4c   :  { %v995_v43 = vpop.eup %994  ;;  %1014 = vrcp.f32 %v158_v37  ;;  %v275_v59 = vsub.f32 0.0, %v274_v50  ;;  %v289_v60 = vadd.f32 %v288_v56, %v286_v51  ;;  %v318_v21 = vstv %s1413_s23  ;;  %s1519_s23 = sld [smem:[#allocation8 + $0x12]] }
  0x4d   :  { %v997_v48 = vpop.eup %996  ;;  %v72_v49 = vmul.f32 %v995_v43, %v71_v47  ;;  %1016 = vpow2.f32 %v231_v38  ;;  %v176_v47 = vstv %s1391_s18  ;;  %v206_v28 = vstv %s1419_s24  ;;  %s1505_s18 = sld [smem:[#allocation8 + $0x10]]  ;;  %s1522_s24 = sld [smem:[#allocation3 + $0x1b]] }
  0x4e   :  { %v999_v52 = vpop.eup %998  ;;  %v87_v53 = vmul.f32 %v997_v48, %v86_v54  ;;  %1018 = vpow2.f32 %v246_v40  ;;  %v300_v54 = vstv %s1396_s19  ;;  %v276_v4 = vmul.f32 1.442695, %v275_v59  ;;  %s1507_s19 = sld [smem:[#allocation8 + $0x11]] }
  0x4f   :  { %v1001_v57 = vpop.eup %1000  ;;  %v173_v58 = vadd.f32 1.0, %v999_v52  ;;  %1020 = vpow2.f32 %v261_v55  ;;  %v290_v6 = vsub.f32 0.0, %v289_v60  ;;  %v330_v30 = vstv %s1421_s25  ;;  %s1524_s25 = sld [smem:[#allocation6 + $0x1b]] }
  0x50   :  { %v1003_v61 = vpop.eup %1002  ;;  %v88_v62 = vadd.f32 %v87_v53, %v72_v49  ;;  %v102_v63 = vmul.f32 %v1001_v57, %v101_v1  ;;  %v301_v1 = vmul.f32 %v300_v54, %v1291_v0  ;;  %v331_v37 = vmul.f32 %v330_v30, %v1291_v0 }
  0x51   :  { %v1005_v2 = vpop.eup %1004  ;;  %v117_v3 = vmul.f32 %v1003_v61, %v116_v5  ;;  %1022 = vrcp.f32 %v173_v58  ;;  %v291_v14 = vmul.f32 1.442695, %v290_v6  ;;  %v333_v38 = vstv %s1428_s26  ;;  %s1527_s26 = sld [smem:[#allocation8 + $0x13]] }
  0x52   :  { %v1007_v7 = vpop.eup %1006  ;;  %v103_v8 = vadd.f32 %v102_v63, %v88_v62  ;;  %v188_v10 = vadd.f32 1.0, %v1005_v2  ;;  %1024 = vpow2.f32 %v276_v4  ;;  %v304_v18 = vadd.f32 %v303_v11, %v301_v1 }
  0x53   :  { %v1009_v12 = vpop.eup %1008  ;;  %v132_v5 = vmul.f32 %v1007_v7, %v131_v9  ;;  %v315_v9 = vstv %s1411_s22  ;;  %v221_v41 = vstv %s1430_s1  ;;  %v345_v42 = vstv %s1434_s0  ;;  %s1516_s22 = sld [smem:[#allocation6 + $0x1a]]  ;;  %s1530_s1 = sld [smem:[#allocation3 + $0x1c]] }
  0x54   :  { %v1011_v15 = vpop.eup %1010  ;;  %v118_v16 = vadd.f32 %v117_v3, %v103_v8  ;;  %1026 = vrcp.f32 %v188_v10  ;;  %v203_v17 = vadd.f32 1.0, %v1009_v12  ;;  %v305_v25 = vsub.f32 0.0, %v304_v18  ;;  %s1534_s0 = sld [smem:[#allocation6 + $0x1c]] }
  0x55   :  { %v1013_v19 = vpop.eup %1012  ;;  %v147_v20 = vmul.f32 %v1011_v15, %v146_v34  ;;  %1028 = vpow2.f32 %v291_v14  ;;  %v316_v29 = vmul.f32 %v315_v9, %v1291_v0  ;;  %v334_v46 = vadd.f32 %v333_v38, %v331_v37 }
  0x56   :  { %v1015_v22 = vpop.eup %1014  ;;  %v133_v23 = vadd.f32 %v132_v5, %v118_v16  ;;  %1030 = vrcp.f32 %v203_v17  ;;  %v218_v24 = vadd.f32 1.0, %v1013_v19  ;;  %v306_v34 = vmul.f32 1.442695, %v305_v25 }
  0x57   :  { %v1017_v26 = vpop.eup %1016  ;;  %v162_v27 = vmul.f32 %v1015_v22, %v161_v44  ;;  %v319_v36 = vadd.f32 %v318_v21, %v316_v29  ;;  %v346_v49 = vmul.f32 %v345_v42, %v1291_v0  ;;  %v348_v50 = vstv %s1439_s27  ;;  %s1539_s27 = sld [smem:[#allocation3 + $0x1d]] }
  0x58   :  { %v1019_v31 = vpop.eup %1018  ;;  %v148_v32 = vadd.f32 %v147_v20, %v133_v23  ;;  %1032 = vrcp.f32 %v218_v24  ;;  %v233_v33 = vadd.f32 1.0, %v1017_v26  ;;  %v236_v52 = vstv %s1443_s28  ;;  %s1541_s28 = sld [smem:[#allocation6 + $0x1d]] }
  0x59   :  { %v248_v35 = vadd.f32 1.0, %v1019_v31  ;;  %v1021_v39 = vpop.eup %1020  ;;  %v320_v45 = vsub.f32 0.0, %v319_v36  ;;  %v335_v55 = vsub.f32 0.0, %v334_v46  ;;  %v360_v59 = vstv %s1447_s29  ;;  %s1546_s29 = sld [smem:[#allocation8 + $0x14]] }
  0x5a   :  { %v163_v40 = vadd.f32 %v162_v27, %v148_v32  ;;  %1034 = vrcp.f32 %v233_v33  ;;  %v263_v44 = vadd.f32 1.0, %v1021_v39  ;;  %v361_v63 = vmul.f32 %v360_v59, %v1291_v0 }
  0x5b   :  { %v1023_v43 = vpop.eup %1022  ;;  %1036 = vrcp.f32 %v248_v35  ;;  %v321_v53 = vmul.f32 1.442695, %v320_v45  ;;  %v336_v62 = vmul.f32 1.442695, %v335_v55  ;;  %v363_v4 = vstv %s1454_s30  ;;  %s1551_s30 = sld [smem:[#allocation3 + $0x1e]] }
  0x5c   :  { %v177_v48 = vmul.f32 %v1023_v43, %v176_v47  ;;  %1038 = vpow2.f32 %v306_v34  ;;  %v1025_v51 = vpop.eup %1024  ;;  %v349_v47 = vadd.f32 %v348_v50, %v346_v49  ;;  %v364_v8 = vadd.f32 %v363_v4, %v361_v63 }
  0x5d   :  { %1040 = vrcp.f32 %v263_v44  ;;  %v278_v58 = vadd.f32 1.0, %v1025_v51  ;;  %v251_v1 = vstv %s1459_s6  ;;  %v375_v12 = vstv %s1462_s7  ;;  %s1556_s6 = sld [smem:[#allocation6 + $0x1e]]  ;;  %s1558_s7 = sld [smem:[#allocation8 + $0x15]] }
  0x5e   :  { %v1027_v56 = vpop.eup %1026  ;;  %v178_v57 = vadd.f32 %v177_v48, %v163_v40  ;;  %1042 = vpow2.f32 %v321_v53  ;;  %v350_v3 = vsub.f32 0.0, %v349_v47  ;;  %v365_v14 = vsub.f32 0.0, %v364_v8 }
  0x5f   :  { %v1029_v60 = vpop.eup %1028  ;;  %v192_v61 = vmul.f32 %v1027_v56, %v191_v13  ;;  %1044 = vrcp.f32 %v278_v58  ;;  %v376_v15 = vmul.f32 %v375_v12, %v1291_v0  ;;  %v266_v17 = vstv %s1464_s8  ;;  %s1562_s8 = sld [smem:[#allocation3 + $0x1f]] }
  0x60   :  { %v1031_v54 = vpop.eup %1030  ;;  %v293_v2 = vadd.f32 1.0, %v1029_v60  ;;  %1046 = vpow2.f32 %v336_v62  ;;  %v351_v11 = vmul.f32 1.442695, %v350_v3  ;;  %v378_v18 = vstv %s1470_s9  ;;  %s1564_s9 = sld [smem:[#allocation8 + $0x16]] }
  0x61   :  { %v193_v6 = vadd.f32 %v192_v61, %v178_v57  ;;  %v207_v7 = vmul.f32 %v1031_v54, %v206_v28  ;;  %v390_v19 = vstv %s1472_s2  ;;  %v366_v22 = vmul.f32 1.442695, %v365_v14  ;;  %s1568_s2 = sld [smem:[#allocation6 + $0x1f]] }
  0x62   :  { %v1033_v10 = vpop.eup %1032  ;;  %1048 = vrcp.f32 %v293_v2  ;;  %v379_v23 = vadd.f32 %v378_v18, %v376_v15  ;;  %v281_v26 = vstv %s1475_s10  ;;  %v391_v27 = vmul.f32 %v390_v19, %v1291_v0  ;;  %s1570_s10 = sld [smem:[#allocation3 + $0x20]] }
  0x63   :  { %v208_v5 = vadd.f32 %v207_v7, %v193_v6  ;;  %v222_v13 = vmul.f32 %v1033_v10, %v221_v41  ;;  %1050 = vpow2.f32 %v351_v11  ;;  %v393_v28 = vstv %s1478_s11  ;;  %s1573_s11 = sld [smem:[#allocation6 + $0x20]] }
  0x64   :  { %v1035_v16 = vpop.eup %1034  ;;  %1052 = vpow2.f32 %v366_v22  ;;  %v380_v32 = vsub.f32 0.0, %v379_v23  ;;  %v394_v34 = vadd.f32 %v393_v28, %v391_v27  ;;  %v405_v35 = vstv %s1484_s12  ;;  %s1577_s12 = sld [smem:[#allocation8 + $0x17]] }
  0x65   :  { %v1037_v20 = vpop.eup %1036  ;;  %v223_v9 = vadd.f32 %v222_v13, %v208_v5  ;;  %v237_v21 = vmul.f32 %v1035_v16, %v236_v52  ;;  %v408_v36 = vstv %s1486_s13  ;;  %v406_v40 = vmul.f32 %v405_v35, %v1291_v0  ;;  %s1579_s13 = sld [smem:[#allocation3 + $0x21]] }
  0x66   :  { %v1039_v24 = vpop.eup %1038  ;;  %v252_v25 = vmul.f32 %v1037_v20, %v251_v1  ;;  %v381_v39 = vmul.f32 1.442695, %v380_v32  ;;  %v296_v42 = vstv %s1489_s14  ;;  %v395_v44 = vsub.f32 0.0, %v394_v34  ;;  %s1584_s14 = sld [smem:[#allocation6 + $0x21]] }
  0x67   :  { %v1041_v29 = vpop.eup %1040  ;;  %v238_v30 = vadd.f32 %v237_v21, %v223_v9  ;;  %v308_v31 = vadd.f32 1.0, %v1039_v24  ;;  %v420_v45 = vstv %s1492_s15  ;;  %v409_v50 = vadd.f32 %v408_v36, %v406_v40  ;;  %s1586_s15 = sld [smem:[#allocation8 + $0x18]] }
  0x68   :  { %v267_v33 = vmul.f32 %v1041_v29, %v266_v17  ;;  %v1043_v37 = vpop.eup %1042  ;;  %v396_v53 = vmul.f32 1.442695, %v395_v44  ;;  %v421_v55 = vmul.f32 %v420_v45, %v1291_v0  ;;  %v423_v47 = vstv %s1498_s16  ;;  %s1589_s16 = sld [smem:[#allocation3 + $0x22]] }
  0x69   :  { %v253_v38 = vadd.f32 %v252_v25, %v238_v30  ;;  %1054 = vrcp.f32 %v308_v31  ;;  %v1045_v41 = vpop.eup %1044  ;;  %v323_v43 = vadd.f32 1.0, %v1043_v37  ;;  %v410_v58 = vsub.f32 0.0, %v409_v50 }
  0x6a   :  { %v1047_v46 = vpop.eup %1046  ;;  %v282_v49 = vmul.f32 %v1045_v41, %v281_v26  ;;  %1056 = vpow2.f32 %v381_v39  ;;  %v424_v60 = vadd.f32 %v423_v47, %v421_v55  ;;  %v435_v61 = vstv %s1503_s17  ;;  %s1592_s17 = sld [smem:[#allocation6 + $0x22]] }
  0x6b   :  { %v268_v48 = vadd.f32 %v267_v33, %v253_v38  ;;  %1058 = vrcp.f32 %v323_v43  ;;  %v338_v52 = vadd.f32 1.0, %v1047_v46  ;;  %v311_v62 = vstv %s1505_s18  ;;  %s1596_s18 = sld [smem:[#allocation8 + $0x19]] }
  0x6c   :  { %v1049_v51 = vpop.eup %1048  ;;  %v411_v54 = vmul.f32 1.442695, %v410_v58  ;;  %v326_v2 = vstv %s1507_s19  ;;  %v425_v3 = vsub.f32 0.0, %v424_v60  ;;  %v436_v4 = vmul.f32 %v435_v61, %v1291_v0  ;;  %s1601_s19 = sld [smem:[#allocation3 + $0x23]] }
  0x6d   :  { %v283_v56 = vadd.f32 %v282_v49, %v268_v48  ;;  %v297_v57 = vmul.f32 %v1049_v51, %v296_v42  ;;  %v1051_v59 = vpop.eup %1050  ;;  %1060 = vrcp.f32 %v338_v52  ;;  %v438_v6 = vstv %s1511_s20  ;;  %s1605_s20 = sld [smem:[#allocation6 + $0x23]] }
  0x6e   :  { %v353_v63 = vadd.f32 1.0, %v1051_v59  ;;  %1062 = vpow2.f32 %v396_v53  ;;  %v1053_v7 = vpop.eup %1052  ;;  %v450_v10 = vstv %s1514_s21  ;;  %v453_v1 = vstv %s1516_s22  ;;  %s1607_s21 = sld [smem:[#allocation8 + $0x1a]]  ;;  %s1610_s22 = sld [smem:[#allocation3 + $0x24]] }
  0x6f   :  { %v298_v8 = vadd.f32 %v297_v57, %v283_v56  ;;  %v368_v11 = vadd.f32 1.0, %v1053_v7  ;;  %v426_v12 = vmul.f32 1.442695, %v425_v3  ;;  %v439_v5 = vadd.f32 %v438_v6, %v436_v4 }
  0x70   :  { %1064 = vrcp.f32 %v353_v63  ;;  %v341_v14 = vstv %s1519_s23  ;;  %v451_v15 = vmul.f32 %v450_v10, %v1291_v0  ;;  %v465_v16 = vstv %s1522_s24  ;;  %s1614_s23 = sld [smem:[#allocation8 + $0x1b]]  ;;  %s1616_s24 = sld [smem:[#allocation6 + $0x24]] }
  0x71   :  { %1066 = vpow2.f32 %v411_v54  ;;  %v468_v17 = vstv %s1524_s25  ;;  %v440_v19 = vsub.f32 0.0, %v439_v5  ;;  %v466_v20 = vmul.f32 %v465_v16, %v1291_v0  ;;  %s1620_s25 = sld [smem:[#allocation3 + $0x25]] }
  0x72   :  { %1068 = vrcp.f32 %v368_v11  ;;  %v356_v21 = vstv %s1527_s26  ;;  %v454_v22 = vadd.f32 %v453_v1, %v451_v15  ;;  %v480_v23 = vstv %s1530_s1  ;;  %s1622_s26 = sld [smem:[#allocation6 + $0x25]]  ;;  %s1625_s1 = sld [smem:[#allocation8 + $0x1c]] }
  0x73   :  { %v1055_v13 = vpop.eup %1054  ;;  %1070 = vpow2.f32 %v426_v12  ;;  %v441_v27 = vmul.f32 1.442695, %v440_v19  ;;  %v469_v28 = vadd.f32 %v468_v17, %v466_v20  ;;  %v481_v31 = vmul.f32 %v480_v23, %v1291_v0 }
  0x74   :  { %v312_v18 = vmul.f32 %v1055_v13, %v311_v62  ;;  %v1057_v9 = vpop.eup %1056  ;;  %v455_v30 = vsub.f32 0.0, %v454_v22  ;;  %v483_v32 = vstv %s1534_s0  ;;  %v495_v35 = vstv %s1539_s27  ;;  %s1723_s0 = sld [smem:[#allocation3 + $0x2f]] }
  0x75   :  { %v1059_v24 = vpop.eup %1058  ;;  %v383_v26 = vadd.f32 1.0, %v1057_v9  ;;  %v470_v34 = vsub.f32 0.0, %v469_v28  ;;  %v498_v36 = vstv %s1541_s28  ;;  %v484_v43 = vadd.f32 %v483_v32, %v481_v31  ;;  %s1636_s28 = sld [smem:[#allocation3 + $0x26]]  ;;  %s1731_s27 = sld [smem:[#allocation6 + $0x2f]] }
  0x76   :  { %v313_v25 = vadd.f32 %v312_v18, %v298_v8  ;;  %v327_v29 = vmul.f32 %v1059_v24, %v326_v2  ;;  %v456_v40 = vmul.f32 1.442695, %v455_v30  ;;  %v496_v44 = vmul.f32 %v495_v35, %v1291_v0 }
  0x77   :  { %v1061_v33 = vpop.eup %1060  ;;  %1072 = vrcp.f32 %v383_v26  ;;  %v471_v42 = vmul.f32 1.442695, %v470_v34  ;;  %v371_v48 = vstv %s1546_s29  ;;  %v510_v49 = vstv %s1551_s30  ;;  %s1643_s29 = sld [smem:[#allocation8 + $0x1d]]  ;;  %s1647_s30 = sld [smem:[#allocation3 + $0x27]] }
  0x78   :  { %v1063_v37 = vpop.eup %1062  ;;  %v328_v38 = vadd.f32 %v327_v29, %v313_v25  ;;  %v342_v39 = vmul.f32 %v1061_v33, %v341_v14  ;;  %1074 = vpow2.f32 %v441_v27  ;;  %v485_v52 = vsub.f32 0.0, %v484_v43  ;;  %v1630_v43 = vld [vmem:[%s1793_s4] sm:$0xff]  ;;  %s1640_s4 = sld [smem:[#allocation6 + $0x26]] }
  0x79   :  { %v398_v41 = vadd.f32 1.0, %v1063_v37  ;;  %1076 = vpow2.f32 %v456_v40  ;;  %v499_v53 = vadd.f32 %v498_v36, %v496_v44  ;;  %v511_v56 = vmul.f32 %v510_v49, %v1291_v0 }
  0x7a   :  { %v1065_v45 = vpop.eup %1064  ;;  %v343_v46 = vadd.f32 %v342_v39, %v328_v38  ;;  %v513_v57 = vstv %s1556_s6  ;;  %v386_v59 = vstv %s1558_s7  ;;  %v486_v60 = vmul.f32 1.442695, %v485_v52  ;;  %s1651_s6 = sld [smem:[#allocation6 + $0x27]]  ;;  %s1654_s7 = sld [smem:[#allocation8 + $0x1e]] }
  0x7b   :  { %v1067_v50 = vpop.eup %1066  ;;  %v357_v51 = vmul.f32 %v1065_v45, %v356_v21  ;;  %1078 = vrcp.f32 %v398_v41  ;;  %v500_v61 = vsub.f32 0.0, %v499_v53  ;;  %v514_v54 = vadd.f32 %v513_v57, %v511_v56 }
  0x7c   :  { %v413_v55 = vadd.f32 1.0, %v1067_v50  ;;  %1080 = vpow2.f32 %v471_v42  ;;  %v1069_v58 = vpop.eup %1068  ;;  %v525_v2 = vstv %s1562_s8  ;;  %v401_v8 = vstv %s1564_s9  ;;  %s1657_s8 = sld [smem:[#allocation3 + $0x28]]  ;;  %s1659_s9 = sld [smem:[#allocation8 + $0x1f]] }
  0x7d   :  { %v358_v47 = vadd.f32 %v357_v51, %v343_v46  ;;  %v1071_v62 = vpop.eup %1070  ;;  %v372_v63 = vmul.f32 %v1069_v58, %v371_v48  ;;  %v501_v4 = vmul.f32 1.442695, %v500_v61  ;;  %v526_v6 = vmul.f32 %v525_v2, %v1291_v0 }
  0x7e   :  { %1082 = vrcp.f32 %v413_v55  ;;  %v428_v3 = vadd.f32 1.0, %v1071_v62  ;;  %v515_v10 = vsub.f32 0.0, %v514_v54  ;;  %v528_v1 = vstv %s1568_s2  ;;  %s1662_s2 = sld [smem:[#allocation6 + $0x28]] }
  0x7f   :  { %1084 = vpow2.f32 %v486_v60  ;;  %v373_v7 = vadd.f32 %v372_v63, %v358_v47  ;;  %v529_v12 = vadd.f32 %v528_v1, %v526_v6  ;;  %v540_v5 = vstv %s1570_s10  ;;  %s1664_s10 = sld [smem:[#allocation3 + $0x29]] }
  0x80   :  { %1086 = vrcp.f32 %v428_v3  ;;  %v543_v13 = vstv %s1573_s11  ;;  %v516_v16 = vmul.f32 1.442695, %v515_v10  ;;  %v541_v17 = vmul.f32 %v540_v5, %v1291_v0  ;;  %s1668_s11 = sld [smem:[#allocation6 + $0x29]] }
  0x81   :  { %v1073_v11 = vpop.eup %1072  ;;  %1088 = vpow2.f32 %v501_v4  ;;  %v416_v18 = vstv %s1577_s12  ;;  %v530_v20 = vsub.f32 0.0, %v529_v12  ;;  %v555_v9 = vstv %s1579_s13  ;;  %s1671_s12 = sld [smem:[#allocation8 + $0x20]]  ;;  %s1674_s13 = sld [smem:[#allocation3 + $0x2a]] }
  0x82   :  { %v1075_v14 = vpop.eup %1074  ;;  %v387_v15 = vmul.f32 %v1073_v11, %v386_v59  ;;  %1090 = vpow2.f32 %v516_v16  ;;  %v544_v23 = vadd.f32 %v543_v13, %v541_v17  ;;  %v556_v24 = vmul.f32 %v555_v9, %v1291_v0 }
  0x83   :  { %v443_v19 = vadd.f32 1.0, %v1075_v14  ;;  %v1077_v21 = vpop.eup %1076  ;;  %v531_v27 = vmul.f32 1.442695, %v530_v20  ;;  %v558_v28 = vstv %s1584_s14  ;;  %v431_v31 = vstv %s1586_s15  ;;  %s1678_s14 = sld [smem:[#allocation6 + $0x2a]]  ;;  %s1682_s15 = sld [smem:[#allocation8 + $0x21]] }
  0x84   :  { %v388_v22 = vadd.f32 %v387_v15, %v373_v7  ;;  %v458_v26 = vadd.f32 1.0, %v1077_v21  ;;  %v545_v32 = vsub.f32 0.0, %v544_v23  ;;  %v559_v33 = vadd.f32 %v558_v28, %v556_v24 }
  0x85   :  { %v1079_v25 = vpop.eup %1078  ;;  %1092 = vrcp.f32 %v443_v19  ;;  %v570_v34 = vstv %s1589_s16  ;;  %v573_v35 = vstv %s1592_s17  ;;  %v446_v42 = vstv %s1596_s18  ;;  %s1688_s16 = sld [smem:[#allocation3 + $0x2b]]  ;;  %s1692_s18 = sld [smem:[#allocation8 + $0x22]] }
  0x86   :  { %v1081_v29 = vpop.eup %1080  ;;  %v402_v30 = vmul.f32 %v1079_v25, %v401_v8  ;;  %1094 = vrcp.f32 %v458_v26  ;;  %v546_v38 = vmul.f32 1.442695, %v545_v32  ;;  %v560_v39 = vsub.f32 0.0, %v559_v33  ;;  %s1690_s17 = sld [smem:[#allocation6 + $0x2b]] }
  0x87   :  { %v473_v0 = vadd.f32 1.0, %v1081_v29  ;;  %1096 = vpow2.f32 %v531_v27  ;;  %v571_v44 = vmul.f32 %v1630_v43, %v570_v34  ;;  %v585_v48 = vstv %s1601_s19  ;;  %s1696_s19 = sld [smem:[#allocation3 + $0x2c]] }
  0x88   :  { %v1083_v36 = vpop.eup %1082  ;;  %v403_v37 = vadd.f32 %v402_v30, %v388_v22  ;;  %v561_v46 = vmul.f32 1.442695, %v560_v39  ;;  %v586_v52 = vmul.f32 %v1630_v43, %v585_v48  ;;  %v588_v53 = vstv %s1605_s20  ;;  %s1699_s20 = sld [smem:[#allocation6 + $0x2c]] }
  0x89   :  { %v1085_v40 = vpop.eup %1084  ;;  %v417_v41 = vmul.f32 %v1083_v36, %v416_v18  ;;  %1098 = vrcp.f32 %v473_v0  ;;  %v574_v51 = vadd.f32 %v573_v35, %v571_v44  ;;  %v461_v57 = vstv %s1607_s21  ;;  %s1701_s21 = sld [smem:[#allocation8 + $0x23]] }
  0x8a   :  { %v488_v45 = vadd.f32 1.0, %v1085_v40  ;;  %1100 = vpow2.f32 %v546_v38  ;;  %v1087_v49 = vpop.eup %1086  ;;  %v600_v58 = vstv %s1610_s22  ;;  %v589_v60 = vadd.f32 %v588_v53, %v586_v52  ;;  %s1706_s22 = sld [smem:[#allocation3 + $0x2d]] }
  0x8b   :  { %v418_v50 = vadd.f32 %v417_v41, %v403_v37  ;;  %v1089_v55 = vpop.eup %1088  ;;  %v432_v56 = vmul.f32 %v1087_v49, %v431_v31  ;;  %v575_v59 = vsub.f32 0.0, %v574_v51  ;;  %v476_v63 = vstv %s1614_s23  ;;  %s1708_s23 = sld [smem:[#allocation6 + $0x2d]] }
  0x8c   :  { %1102 = vrcp.f32 %v488_v45  ;;  %v503_v47 = vadd.f32 1.0, %v1089_v55  ;;  %v1091_v61 = vpop.eup %1090  ;;  %v601_v54 = vmul.f32 %v1630_v43, %v600_v58  ;;  %v603_v2 = vstv %s1616_s24  ;;  %s1710_s24 = sld [smem:[#allocation8 + $0x24]] }
  0x8d   :  { %1104 = vpow2.f32 %v561_v46  ;;  %v433_v62 = vadd.f32 %v432_v56, %v418_v50  ;;  %v518_v4 = vadd.f32 1.0, %v1091_v61  ;;  %v576_v6 = vmul.f32 1.442695, %v575_v59 }
  0x8e   :  { %1106 = vrcp.f32 %v503_v47  ;;  %v590_v7 = vsub.f32 0.0, %v589_v60  ;;  %v604_v10 = vadd.f32 %v603_v2, %v601_v54  ;;  %v615_v1 = vstv %s1620_s25  ;;  %s1713_s25 = sld [smem:[#allocation3 + $0x2e]] }
  0x8f   :  { %v1093_v3 = vpop.eup %1092  ;;  %v618_v11 = vstv %s1622_s26  ;;  %v491_v5 = vstv %s1625_s1  ;;  %1108 = vrcp.f32 %v518_v4  ;;  %v616_v14 = vmul.f32 %v1630_v43, %v615_v1  ;;  %s1715_s26 = sld [smem:[#allocation6 + $0x2e]]  ;;  %s1719_s1 = sld [smem:[#allocation8 + $0x25]] }
  0x90   :  { %v447_v8 = vmul.f32 %v1093_v3, %v446_v42  ;;  %v1095_v12 = vpop.eup %1094  ;;  %v591_v13 = vmul.f32 1.442695, %v590_v7  ;;  %1110 = vpow2.f32 %v576_v6  ;;  %v605_v18 = vsub.f32 0.0, %v604_v10 }
  0x91   :  { %v1097_v15 = vpop.eup %1096  ;;  %v462_v17 = vmul.f32 %v1095_v12, %v461_v57  ;;  %v619_v9 = vadd.f32 %v618_v11, %v616_v14  ;;  %v630_v21 = vstv %s1636_s28  ;;  %v633_v29 = vstv %s1640_s4  ;;  %s1733_s28 = sld [smem:[#allocation8 + $0x26]]  ;;  %s1739_s4 = sld [smem:[#allocation3 + $0x30]] }
  0x92   :  { %v448_v16 = vadd.f32 %v447_v8, %v433_v62  ;;  %v533_v20 = vadd.f32 1.0, %v1097_v15  ;;  %1112 = vpow2.f32 %v591_v13  ;;  %v606_v25 = vmul.f32 1.442695, %v605_v18 }
  0x93   :  { %v1099_v19 = vpop.eup %1098  ;;  %v631_v26 = vmul.f32 %v1630_v43, %v630_v21  ;;  %v620_v28 = vsub.f32 0.0, %v619_v9  ;;  %v506_v32 = vstv %s1643_s29  ;;  %v645_v36 = vstv %s1647_s30  ;;  %s1741_s29 = sld [smem:[#allocation6 + $0x30]]  ;;  %s1745_s30 = sld [smem:[#allocation3 + $0x31]] }
  0x94   :  { %v1101_v22 = vpop.eup %1100  ;;  %v463_v23 = vadd.f32 %v462_v17, %v448_v16  ;;  %v477_v24 = vmul.f32 %v1099_v19, %v476_v63  ;;  %1114 = vrcp.f32 %v533_v20  ;;  %v646_v39 = vmul.f32 %v1630_v43, %v645_v36 }
  0x95   :  { %v548_v27 = vadd.f32 1.0, %v1101_v22  ;;  %1116 = vpow2.f32 %v606_v25  ;;  %v634_v33 = vadd.f32 %v633_v29, %v631_v26  ;;  %v621_v35 = vmul.f32 1.442695, %v620_v28 }
  0x96   :  { %v1103_v30 = vpop.eup %1102  ;;  %v478_v31 = vadd.f32 %v477_v24, %v463_v23  ;;  %v648_v40 = vstv %s1651_s6  ;;  %v521_v44 = vstv %s1654_s7  ;;  %v660_v45 = vstv %s1657_s8  ;;  %s1748_s6 = sld [smem:[#allocation6 + $0x31]]  ;;  %s1750_s7 = sld [smem:[#allocation8 + $0x27]] }
  0x97   :  { %v1105_v0 = vpop.eup %1104  ;;  %v492_v34 = vmul.f32 %v1103_v30, %v491_v5  ;;  %1118 = vrcp.f32 %v548_v27  ;;  %v635_v38 = vsub.f32 0.0, %v634_v33  ;;  %v649_v49 = vadd.f32 %v648_v40, %v646_v39  ;;  %s1755_s8 = sld [smem:[#allocation8 + $0x28]] }
  0x98   :  { %v563_v37 = vadd.f32 1.0, %v1105_v0  ;;  %v1107_v41 = vpop.eup %1106  ;;  %1120 = vpow2.f32 %v621_v35  ;;  %v536_v51 = vstv %s1659_s9  ;;  %v661_v52 = vmul.f32 %v1630_v43, %v660_v45  ;;  %s1757_s9 = sld [smem:[#allocation8 + $0x29]] }
  0x99   :  { %v493_v42 = vadd.f32 %v492_v34, %v478_v31  ;;  %v507_v46 = vmul.f32 %v1107_v41, %v506_v32  ;;  %v636_v48 = vmul.f32 1.442695, %v635_v38  ;;  %v1109_v50 = vpop.eup %1108  ;;  %v663_v53 = vstv %s1662_s2  ;;  %s1762_s2 = sld [smem:[#allocation8 + $0x2a]] }
  0x9a   :  { %1122 = vrcp.f32 %v563_v37  ;;  %v675_v55 = vstv %s1664_s10  ;;  %v1111_v56 = vpop.eup %1110  ;;  %v522_v58 = vmul.f32 %v1109_v50, %v521_v44  ;;  %v650_v47 = vsub.f32 0.0, %v649_v49  ;;  %s1770_s10 = sld [smem:[#allocation8 + $0x2b]] }
  0x9b   :  { %v508_v57 = vadd.f32 %v507_v46, %v493_v42  ;;  %1124 = vpow2.f32 %v636_v48  ;;  %v578_v60 = vadd.f32 1.0, %v1111_v56  ;;  %v664_v61 = vadd.f32 %v663_v53, %v661_v52 }
  0x9c   :  { %v1113_v59 = vpop.eup %1112  ;;  %v676_v62 = vmul.f32 %v1630_v43, %v675_v55  ;;  %v678_v63 = vstv %s1668_s11  ;;  %v551_v2 = vstv %s1671_s12  ;;  %v651_v4 = vmul.f32 1.442695, %v650_v47  ;;  %s960_s11 = sld [smem:[#allocation8 + $0x2c]]  ;;  %s963_s12 = sld [smem:[#allocation8 + $0x2d]] }
  0x9d   :  { %v523_v54 = vadd.f32 %v522_v58, %v508_v57  ;;  %v593_v3 = vadd.f32 1.0, %v1113_v59  ;;  %1126 = vrcp.f32 %v578_v60  ;;  %v665_v7 = vsub.f32 0.0, %v664_v61 }
  0x9e   :  { %v1115_v6 = vpop.eup %1114  ;;  %v679_v8 = vadd.f32 %v678_v63, %v676_v62  ;;  %v690_v10 = vstv %s1674_s13  ;;  %v693_v5 = vstv %s1678_s14  ;;  %v566_v19 = vstv %s1682_s15  ;;  %s966_s13 = sld [smem:[#allocation8 + $0x2e]]  ;;  %s969_s14 = sld [smem:[#allocation8 + $0x2f]] }
  0x9f   :  { %v1117_v1 = vpop.eup %1116  ;;  %v537_v11 = vmul.f32 %v1115_v6, %v536_v51  ;;  %1128 = vrcp.f32 %v593_v3  ;;  %v691_v12 = vmul.f32 %v1630_v43, %v690_v10  ;;  %v666_v15 = vmul.f32 1.442695, %v665_v7  ;;  %s972_s15 = sld [smem:[#allocation8 + $0x30]] }
  0xa0   :  { %v608_v14 = vadd.f32 1.0, %v1117_v1  ;;  %1130 = vpow2.f32 %v651_v4  ;;  %v680_v16 = vsub.f32 0.0, %v679_v8  ;;  %v705_v22 = vstv %s1688_s16  ;;  %s975_s16 = sld [smem:[#allocation8 + $0x31]] }
  0xa1   :  { %v1119_v13 = vpop.eup %1118  ;;  %v538_v17 = vadd.f32 %v537_v11, %v523_v54  ;;  %v694_v20 = vadd.f32 %v693_v5, %v691_v12  ;;  %v708_v23 = vstv %s1690_s17  ;;  %v581_v29 = vstv %s1692_s18 }
  0xa2   :  { %v552_v18 = vmul.f32 %v1119_v13, %v551_v2  ;;  %v1121_v9 = vpop.eup %1120  ;;  %1132 = vrcp.f32 %v608_v14  ;;  %v681_v21 = vmul.f32 1.442695, %v680_v16  ;;  %v706_v30 = vmul.f32 %v1630_v43, %v705_v22 }
  0xa3   :  { %v623_v26 = vadd.f32 1.0, %v1121_v9  ;;  %1134 = vpow2.f32 %v666_v15  ;;  %v695_v27 = vsub.f32 0.0, %v694_v20  ;;  %v720_v33 = vstv %s1696_s19  ;;  %s1248_s19 = smov [#allocation9]  }
  0xa4   :  { %v1123_v24 = vpop.eup %1122  ;;  %v553_v25 = vadd.f32 %v552_v18, %v538_v17  ;;  %1136 = vpow2.f32 %v681_v21  ;;  %v723_v0 = vstv %s1699_s20  ;;  %v596_v34 = vstv %s1701_s21  ;;  %s819_s20 = sshll.u32 %s1248_s19, 4  ;;  %s820_s20 = int_to_ptr.vmem [resolvable:$true] %s819_s20 }
  0xa5   :  { %v567_v28 = vmul.f32 %v1123_v24, %v566_v19  ;;  %v1125_v31 = vpop.eup %1124  ;;  %1138 = vrcp.f32 %v623_v26  ;;  %v696_v32 = vmul.f32 1.442695, %v695_v27  ;;  %v709_v36 = vadd.f32 %v708_v23, %v706_v30  ;;  %s1217_s21 = scalar_lea.vmem %s820_s20, 128  ;;  %p1222_p2 = scmp.lt.s32.totalorder %s820_s20, %s820_s20 }
  0xa6   :  { %v638_v35 = vadd.f32 1.0, %v1125_v31  ;;  %v721_v37 = vmul.f32 %v1630_v43, %v720_v33  ;;  %v735_v39 = vstv %s1706_s22  ;;  %v738_v40 = vstv %s1708_s23  ;;  %p1218_p1 = scmp.ne.s32.totalorder %s820_s20, %s1217_s21  ;;  %p1223_p3 = scmp.lt.s32.totalorder %s1217_s21, %s1217_s21 }
  0xa7   :  { %v568_v38 = vadd.f32 %v567_v28, %v553_v25  ;;  %1140 = vpow2.f32 %v696_v32  ;;  %v1127_v41 = vpop.eup %1126  ;;  %v710_v42 = vsub.f32 0.0, %v709_v36  ;;  %v736_v45 = vmul.f32 %v1630_v43, %v735_v39 }
  0xa8   :  { %1142 = vrcp.f32 %v638_v35  ;;  %v724_v44 = vadd.f32 %v723_v0, %v721_v37  ;;  %v582_v48 = vmul.f32 %v1127_v41, %v581_v29  ;;  %v611_v49 = vstv %s1710_s24  ;;  %p1224_p4 = por %p1223_p3, %p1222_p2 }
  0xa9   :  { %v1129_v46 = vpop.eup %1128  ;;  %v750_v50 = vstv %s1713_s25  ;;  %v753_v51 = vstv %s1715_s26  ;;  %v711_v55 = vmul.f32 1.442695, %v710_v42  ;;  %v739_v57 = vadd.f32 %v738_v40, %v736_v45 }
  0xaa   :  { %v1131_v52 = vpop.eup %1130  ;;  %v597_v53 = vmul.f32 %v1129_v46, %v596_v34  ;;  %v725_v56 = vsub.f32 0.0, %v724_v44  ;;  %v583_v58 = vadd.f32 %v582_v48, %v568_v38  ;;  %v626_v47 = vstv %s1719_s1  ;;  %p1225_p5 = pnand %p1224_p4, %p1218_p1 }
  0xab   :  { %v653_v59 = vadd.f32 1.0, %v1131_v52  ;;  %v751_v60 = vmul.f32 %v1630_v43, %v750_v50  ;;  %1144 = vpow2.f32 %v711_v55  ;;  %v740_v63 = vsub.f32 0.0, %v739_v57 }
  0xac   :  { %v1133_v61 = vpop.eup %1132  ;;  %v726_v62 = vmul.f32 1.442695, %v725_v56  ;;  %v765_v54 = vstv %s1723_s0  ;;  %v598_v3 = vadd.f32 %v597_v53, %v583_v58  ;;  %v768_v14 = vstv %s1731_s27 }
  0xad   :  { %v1135_v2 = vpop.eup %1134  ;;  %v612_v4 = vmul.f32 %v1133_v61, %v611_v49  ;;  %1146 = vrcp.f32 %v653_v59  ;;  %v754_v6 = vadd.f32 %v753_v51, %v751_v60  ;;  %v741_v10 = vmul.f32 1.442695, %v740_v63 }
  0xae   :  { %v1137_v7 = vpop.eup %1136  ;;  %v668_v8 = vadd.f32 1.0, %v1135_v2  ;;  %1148 = vpow2.f32 %v726_v62  ;;  %v766_v1 = vmul.f32 %v1630_v43, %v765_v54  ;;  %v641_v16 = vstv %s1733_s28 }
  0xaf   :  { %v1139_v11 = vpop.eup %1138  ;;  %v613_v12 = vadd.f32 %v612_v4, %v598_v3  ;;  %v683_v5 = vadd.f32 1.0, %v1137_v7  ;;  %v755_v13 = vsub.f32 0.0, %v754_v6  ;;  %v780_v20 = vstv %s1739_s4 }
  0xb0   :  { %v627_v15 = vmul.f32 %v1139_v11, %v626_v47  ;;  %1150 = vrcp.f32 %v668_v8  ;;  %v769_v17 = vadd.f32 %v768_v14, %v766_v1  ;;  %v783_v9 = vstv %s1741_s29 }
  0xb1   :  { %v1141_v18 = vpop.eup %1140  ;;  %1152 = vrcp.f32 %v683_v5  ;;  %v756_v19 = vmul.f32 1.442695, %v755_v13  ;;  %v781_v26 = vmul.f32 %v1630_v43, %v780_v20  ;;  %v795_v28 = vstv %s1745_s30 }
  0xb2   :  { %v1143_v21 = vpop.eup %1142  ;;  %v628_v22 = vadd.f32 %v627_v15, %v613_v12  ;;  %v698_v23 = vadd.f32 1.0, %v1141_v18  ;;  %1154 = vpow2.f32 %v741_v10  ;;  %v770_v24 = vsub.f32 0.0, %v769_v17 }
  0xb3   :  { %v642_v25 = vmul.f32 %v1143_v21, %v641_v16  ;;  %1156 = vpow2.f32 %v756_v19  ;;  %v798_v29 = vstv %s1748_s6  ;;  %v656_v30 = vstv %s1750_s7 }
  0xb4   :  { %1158 = vrcp.f32 %v698_v23  ;;  %v771_v27 = vmul.f32 1.442695, %v770_v24  ;;  %v784_v31 = vadd.f32 %v783_v9, %v781_v26  ;;  %v796_v32 = vmul.f32 %v1630_v43, %v795_v28 }
  0xb5   :  { %v1145_v33 = vpop.eup %1144  ;;  %v643_v0 = vadd.f32 %v642_v25, %v628_v22  ;;  %v671_v40 = vstv %s1755_s8  ;;  %v686_v41 = vstv %s1757_s9  ;;  %v701_v53 = vstv %s1762_s2 }
  0xb6   :  { %1160 = vpow2.f32 %v771_v27  ;;  %v713_v35 = vadd.f32 1.0, %v1145_v33  ;;  %v785_v36 = vsub.f32 0.0, %v784_v31  ;;  %v799_v37 = vadd.f32 %v798_v29, %v796_v32 }
  0xb7   :  { %v1147_v34 = vpop.eup %1146  ;;  %v716_v62 = vstv %s1770_s10  ;;  %v731_v3 = vstv %s960_s11  ;;  %v746_v11 = vstv %s963_s12  ;;  %v761_v13 = vstv %s966_s13 }
  0xb8   :  { %v1149_v38 = vpop.eup %1148  ;;  %v657_v39 = vmul.f32 %v1147_v34, %v656_v30  ;;  %1162 = vrcp.f32 %v713_v35  ;;  %v786_v44 = vmul.f32 1.442695, %v785_v36  ;;  %v800_v45 = vsub.f32 0.0, %v799_v37 }
  0xb9   :  { %v728_v42 = vadd.f32 1.0, %v1149_v38  ;;  %v776_v19 = vstv %s969_s14  ;;  %v791_v23 = vstv %s972_s15  ;;  %v806_v25 = vstv %s975_s16 }
  0xba   :  { %v1151_v46 = vpop.eup %1150  ;;  %v658_v43 = vadd.f32 %v657_v39, %v643_v0  ;;  %v801_v50 = vmul.f32 1.442695, %v800_v45  ;;  %v810_v31 = vstv %s1792_s3 }
  0xbb   :  { %v1153_v48 = vpop.eup %1152  ;;  %v672_v49 = vmul.f32 %v1151_v46, %v671_v40  ;;  %1164 = vrcp.f32 %v728_v42 }
  0xbc   :  { %v1155_v51 = vpop.eup %1154  ;;  %v687_v52 = vmul.f32 %v1153_v48, %v686_v41  ;;  %1166 = vpow2.f32 %v786_v44 }
  0xbd   :  { %v1157_v55 = vpop.eup %1156  ;;  %v673_v56 = vadd.f32 %v672_v49, %v658_v43  ;;  %v743_v57 = vadd.f32 1.0, %v1155_v51  ;;  %1168 = vpow2.f32 %v801_v50 }
  0xbe   :  { %v1159_v58 = vpop.eup %1158  ;;  %v758_v47 = vadd.f32 1.0, %v1157_v55 }
  0xbf   :  { %v688_v59 = vadd.f32 %v687_v52, %v673_v56  ;;  %v702_v60 = vmul.f32 %v1159_v58, %v701_v53  ;;  %1170 = vrcp.f32 %v743_v57 }
  0xc0   :  { %v1161_v61 = vpop.eup %1160  ;;  %1172 = vrcp.f32 %v758_v47 }
  0xc1   :  { %v773_v63 = vadd.f32 1.0, %v1161_v61  ;;  %v703_v54 = vadd.f32 %v702_v60, %v688_v59 }
  0xc2   :  { %v1163_v2 = vpop.eup %1162 }
  0xc3   :  { %1174 = vrcp.f32 %v773_v63  ;;  %v717_v4 = vmul.f32 %v1163_v2, %v716_v62 }
  0xc5   :  { %v1165_v6 = vpop.eup %1164  ;;  %v718_v8 = vadd.f32 %v717_v4, %v703_v54 }
  0xc6   :  { %v1167_v7 = vpop.eup %1166  ;;  %v732_v10 = vmul.f32 %v1165_v6, %v731_v3 }
  0xc7   :  { %v1169_v1 = vpop.eup %1168  ;;  %v788_v12 = vadd.f32 1.0, %v1167_v7 }
  0xc8   :  { %v733_v5 = vadd.f32 %v732_v10, %v718_v8  ;;  %v803_v14 = vadd.f32 1.0, %v1169_v1 }
  0xc9   :  { %v1171_v15 = vpop.eup %1170  ;;  %1176 = vrcp.f32 %v788_v12 }
  0xca   :  { %v1173_v16 = vpop.eup %1172  ;;  %v747_v17 = vmul.f32 %v1171_v15, %v746_v11  ;;  %1178 = vrcp.f32 %v803_v14 }
  0xcb   :  { %v762_v18 = vmul.f32 %v1173_v16, %v761_v13 }
  0xcc   :  { %v748_v20 = vadd.f32 %v747_v17, %v733_v5 }
  0xcd   :  { %v1175_v9 = vpop.eup %1174 }
  0xce   :  { %v763_v21 = vadd.f32 %v762_v18, %v748_v20  ;;  %v777_v22 = vmul.f32 %v1175_v9, %v776_v19 }
  0xd0   :  { %v778_v24 = vadd.f32 %v777_v22, %v763_v21 }
  0xd3   :  { %v1177_v26 = vpop.eup %1176 }
  0xd4   :  { %v1179_v27 = vpop.eup %1178  ;;  %v792_v28 = vmul.f32 %v1177_v26, %v791_v23 }
  0xd5   :  { %v807_v29 = vmul.f32 %v1179_v27, %v806_v25 }
  0xd6   :  { %v793_v30 = vadd.f32 %v792_v28, %v778_v24 }
  0xd8   :  { %v808_v32 = vadd.f32 %v807_v29, %v793_v30 }
  0xda   :  { %v811_v33 = vadd.f32 %v810_v31, %v808_v32 }
  0xdc   :  { %812 = vst [vmem:[#allocation9] sm:$0xff] %v811_v33 }
  0xdd   :  { %1228 = shalt.err (!%p1225_p5)
}
  0xde   :  { %s1229_s24 = scalar_lea.hbm %s1794_s5, 128 }
  0xdf   :  { %p1230_p6 = scmp.ne.s32.totalorder %s1794_s5, %s1229_s24  ;;  %p1233_p7 = scmp.lt.u32.totalorder %s1229_s24, %s1794_s5 }
  0xe1   :  { %p1235_p8 = pnand %p1233_p7, %p1230_p6 }
  0xe3   :  { %1238 = shalt.err (!%p1235_p8)
}
  0xe4   :  { %822 = dma.vmem_to_hbm [thread:$0]  %s820_s20, 128, %s1794_s5, [#allocation4]  }
  0xe5   :  { %1243 = dma.done.wait [#allocation4], 128  }
  0xe6   :  { %1244 = vsyncadd [#allocation4], 4294967168 }
  0xe7   :  { %826 = vsyncpa [#allocation4], 1 }
  0xe8   :  { %827 = vsyncpa [#allocation5], 1 }
  0xe9   :  { %828 = vsyncpa [#allocation7], 1 }

</bundles_post_ra>
